<compile_context>
chip_gen: v5e
topology: v5e:2x2
jax: 0.10.0
libtpu: 0.0.40
codegen_flags: <defaults>
</compile_context>

<pallas_src>
import functools

import jax
import jax.numpy as jnp
from jax import lax
from jax.experimental import pallas as pl
from jax.experimental.pallas import tpu as pltpu

LANE = 128  # TPU vreg lane width; expanded channel dim is padded to this.


# ----------------------------------------------------------------------------
# Fused Pallas kernel: 1x1 conv -> ReLU -> depthwise KxK -> ReLU -> 1x1 conv
# (+ residual).  BN is pre-folded into the weights; only bias adds remain.
# ----------------------------------------------------------------------------
def _cell_kernel(x_ref, w1_ref, b1_ref, w2_ref, b2_ref, w3_ref, b3_ref,
                 o_ref, buf_ref, *, K, H, W, P, cin, cout, residual):
    midp = w1_ref.shape[1]          # lane-padded expanded channels (128)
    hw = H * W

    # ---- conv1 (1x1, BN folded) + ReLU -> lane-dense (HW, midp) ----
    x2d = x_ref[...].reshape(hw, cin).astype(jnp.float32)
    h1 = jnp.dot(x2d, w1_ref[...], preferred_element_type=jnp.float32)
    h1 = jnp.maximum(h1 + b1_ref[...], 0.0)

    # ---- 'same' halo padding lives only in VMEM scratch ----
    buf_ref[...] = jnp.zeros_like(buf_ref)
    buf_ref[P:P + H, P:P + W, :] = h1.reshape(H, W, midp)

    # ---- depthwise KxK (BN folded) + ReLU: K*K shifted VPU MACs ----
    w2 = w2_ref[...]                              # (K*K, midp), hoisted load
    acc = buf_ref[0:H, 0:W, :] * w2[0]            # start from first tap
    for dh in range(K):
        for dw in range(K):
            if dh == 0 and dw == 0:
                continue
            acc = acc + buf_ref[dh:dh + H, dw:dw + W, :] * w2[dh * K + dw]
    h2 = jnp.maximum(acc + b2_ref[...], 0.0).reshape(hw, midp)

    # ---- conv3 (1x1, BN folded) + bias (+ residual, cin==cout, stride 1) ----
    y = jnp.dot(h2, w3_ref[...], preferred_element_type=jnp.float32)
    y = y + b3_ref[...]
    if residual:
        y = y + x2d
    o_ref[...] = y.reshape(1, H, W, cout).astype(o_ref.dtype)


def fused_linear_bottleneck_cell(x_nhwc, kp, *, k, cin, cout, residual):
    """Single fused pallas_call over the batch dimension (NHWC in/out)."""
    N, H, W, _ = x_nhwc.shape
    P = k // 2
    midp = kp["w1p"].shape[1]
    kernel = functools.partial(
        _cell_kernel, K=k, H=H, W=W, P=P, cin=cin, cout=cout, residual=residual
    )
    return pl.pallas_call(
        kernel,
        out_shape=jax.ShapeDtypeStruct((N, H, W, cout), jnp.float32),
        grid=(N,),
        in_specs=[
            pl.BlockSpec((1, H, W, cin), lambda n: (n, 0, 0, 0)),
            pl.BlockSpec((cin, midp), lambda n: (0, 0)),
            pl.BlockSpec((1, midp), lambda n: (0, 0)),
            pl.BlockSpec((k * k, midp), lambda n: (0, 0)),
            pl.BlockSpec((1, midp), lambda n: (0, 0)),
            pl.BlockSpec((midp, cout), lambda n: (0, 0)),
            pl.BlockSpec((1, cout), lambda n: (0, 0)),
        ],
        out_specs=pl.BlockSpec((1, H, W, cout), lambda n: (n, 0, 0, 0)),
        scratch_shapes=[
            pltpu.VMEM((H + 2 * P, W + 2 * P, midp), jnp.float32),
        ],
        compiler_params=pltpu.CompilerParams(
            dimension_semantics=("parallel",),
        ),
    )(x_nhwc, kp["w1p"], kp["b1p"], kp["w2p"], kp["b2p"], kp["w3p"], kp["b3p"])


# ----------------------------------------------------------------------------
# Parameters (deterministic, synthetic) + BN fold / lane padding
# ----------------------------------------------------------------------------
def _bn_scale_bias(key, c, eps=1e-5):
    k1, k2 = jax.random.split(key)
    gamma = 1.0 + 0.1 * jax.random.normal(k1, (c,), jnp.float32)
    beta = 0.05 * jax.random.normal(k2, (c,), jnp.float32)
    running_mean = jnp.zeros((c,), jnp.float32)
    running_var = jnp.ones((c,), jnp.float32)
    scale = gamma / jnp.sqrt(running_var + eps)
    bias = beta - running_mean * scale
    return scale, bias


def make_linear_bottleneck_params(key, cin, cout, k, t):
    """Raw parameters matching the PyTorch LinearBottleneck (BN inference)."""
    mid = cin * t
    ks = jax.random.split(key, 6)
    w1 = 0.1 * jax.random.normal(ks[0], (cin, mid), jnp.float32)    # 1x1
    w2 = 0.1 * jax.random.normal(ks[1], (k * k, mid), jnp.float32)  # depthwise
    w3 = 0.1 * jax.random.normal(ks[2], (mid, cout), jnp.float32)   # 1x1
    s1, b1 = _bn_scale_bias(ks[3], mid)
    s2, b2 = _bn_scale_bias(ks[4], mid)
    s3, b3 = _bn_scale_bias(ks[5], cout)
    return dict(w1=w1, w2=w2, w3=w3, s1=s1, b1=b1, s2=s2, b2=b2, s3=s3, b3=b3)


def fold_params_for_kernel(p, *, cin, cout, k, t):
    """Fold BN scales into conv weights and zero-pad mid -> 128 lanes."""
    mid = cin * t
    midp = max(LANE, ((mid + LANE - 1) // LANE) * LANE)

    w1f = (p["w1"] * p["s1"][None, :]).astype(jnp.float32)
    w2f = (p["w2"] * p["s2"][None, :]).astype(jnp.float32)
    w3f = (p["w3"] * p["s3"][None, :]).astype(jnp.float32)

    w1p = jnp.zeros((cin, midp), jnp.float32).at[:, :mid].set(w1f)
    b1p = jnp.zeros((1, midp), jnp.float32).at[0, :mid].set(p["b1"])
    w2p = jnp.zeros((k * k, midp), jnp.float32).at[:, :mid].set(w2f)
    b2p = jnp.zeros((1, midp), jnp.float32).at[0, :mid].set(p["b2"])
    w3p = jnp.zeros((midp, cout), jnp.float32).at[:mid, :].set(w3f)
    b3p = p["b3"].reshape(1, cout).astype(jnp.float32)
    return dict(w1p=w1p, b1p=b1p, w2p=w2p, b2p=b2p, w3p=w3p, b3p=b3p)


# ----------------------------------------------------------------------------
# AlignedSupValCell forward (Pallas), NCHW boundary to match PyTorch
# ----------------------------------------------------------------------------
@functools.partial(jax.jit, static_argnames=("cin", "cout", "stride", "k", "t"))
def aligned_sup_val_cell_forward(x_nchw, kparams, *, cin, cout, stride, k, t):
    assert stride == 1, "only stride=1 implemented (residual path)"
    N, C, H, W = x_nchw.shape
    assert C == cin
    residual = (cin == cout and stride == 1)

    x_nhwc = jnp.transpose(x_nchw, (0, 2, 3, 1)).astype(jnp.float32)
    out_nhwc = fused_linear_bottleneck_cell(
        x_nhwc, kparams, k=k, cin=cin, cout=cout, residual=residual
    )
    return jnp.transpose(out_nhwc, (0, 3, 1, 2))  # back to NCHW


# ----------------------------------------------------------------------------
# Pure-JAX reference (uses the RAW, unfolded params)
# ----------------------------------------------------------------------------
def reference_forward(x_nchw, params, *, cin, cout, stride, k, t):
    mid = cin * t
    x = jnp.transpose(x_nchw, (0, 2, 3, 1)).astype(jnp.float32)  # NHWC

    h = jnp.einsum("nhwc,cd->nhwd", x, params["w1"])
    h = h * params["s1"] + params["b1"]
    h = jnp.maximum(h, 0.0)

    wdw = params["w2"].reshape(k, k, 1, mid)
    h = lax.conv_general_dilated(
        h, wdw, window_strides=(stride, stride), padding="SAME",
        dimension_numbers=("NHWC", "HWIO", "NHWC"), feature_group_count=mid,
    )
    h = h * params["s2"] + params["b2"]
    h = jnp.maximum(h, 0.0)

    h = jnp.einsum("nhwc,cd->nhwd", h, params["w3"])
    h = h * params["s3"] + params["b3"]
    if cin == cout and stride == 1:
        h = h + x
    return jnp.transpose(h, (0, 3, 1, 2))


# ----------------------------------------------------------------------------
if __name__ == "__main__":
    # Cell config: branch=2 -> LinearBottleneck(k=3, t=6), cin == cout, stride 1
    N, CIN, COUT, H, W = 2, 4, 4, 16, 16
    STRIDE, K, T = 1, 3, 6

    key = jax.random.PRNGKey(0)
    kx, kp = jax.random.split(key)
    x = jax.random.normal(kx, (N, CIN, H, W), jnp.float32)  # NCHW input

    raw_params = make_linear_bottleneck_params(kp, CIN, COUT, K, T)
    kparams = fold_params_for_kernel(raw_params, cin=CIN, cout=COUT, k=K, t=T)

    out = aligned_sup_val_cell_forward(
        x, kparams, cin=CIN, cout=COUT, stride=STRIDE, k=K, t=T
    )
    out = jax.block_until_ready(out)

    ref = reference_forward(x, raw_params, cin=CIN, cout=COUT, stride=STRIDE, k=K, t=T)
    assert out.shape == (N, COUT, H, W)
    assert jnp.allclose(out, ref, atol=1e-2, rtol=1e-2), (
        float(jnp.max(jnp.abs(out - ref)))
    )
    print("KERNEL_OK")
</pallas_src>

<mosaic_0001>
module attributes {stable_mosaic.version = 11 : i64} {
  func.func @_cell_kernel(%arg0: i32, %arg1: memref<1x16x16x4xf32, #tpu.memory_space<vmem>>, %arg2: memref<4x128xf32, #tpu.memory_space<vmem>>, %arg3: memref<1x128xf32, #tpu.memory_space<vmem>>, %arg4: memref<9x128xf32, #tpu.memory_space<vmem>>, %arg5: memref<1x128xf32, #tpu.memory_space<vmem>>, %arg6: memref<128x4xf32, #tpu.memory_space<vmem>>, %arg7: memref<1x4xf32, #tpu.memory_space<vmem>>, %arg8: memref<1x16x16x4xf32, #tpu.memory_space<vmem>>, %arg9: memref<18x18x128xf32, #tpu.memory_space<vmem>>) attributes {dimension_semantics = [#tpu.dimension_semantics<parallel>], iteration_bounds = array<i64: 2>, scalar_prefetch = 0 : i64, scratch_operands = 1 : i64, tpu.core_type = #tpu.core_type<tc>, window_params = [{transform_indices = @transform_0, window_bounds = array<i64: 1, 16, 16, 4>}, {pipeline_mode = #tpu.pipeline_mode<synchronous>, transform_indices = @transform_1, window_bounds = array<i64: 4, 128>}, {pipeline_mode = #tpu.pipeline_mode<synchronous>, transform_indices = @transform_2, window_bounds = array<i64: 1, 128>}, {pipeline_mode = #tpu.pipeline_mode<synchronous>, transform_indices = @transform_3, window_bounds = array<i64: 9, 128>}, {pipeline_mode = #tpu.pipeline_mode<synchronous>, transform_indices = @transform_4, window_bounds = array<i64: 1, 128>}, {pipeline_mode = #tpu.pipeline_mode<synchronous>, transform_indices = @transform_5, window_bounds = array<i64: 128, 4>}, {pipeline_mode = #tpu.pipeline_mode<synchronous>, transform_indices = @transform_6, window_bounds = array<i64: 1, 4>}, {transform_indices = @transform_7, window_bounds = array<i64: 1, 16, 16, 4>}]} {
    %c0 = arith.constant 0 : index
    %c0_0 = arith.constant 0 : index
    %c0_1 = arith.constant 0 : index
    %c0_2 = arith.constant 0 : index
    %0 = vector.load %arg1[%c0, %c0_0, %c0_1, %c0_2] : memref<1x16x16x4xf32, #tpu.memory_space<vmem>>, vector<1x16x16x4xf32>
    %1 = vector.shape_cast %0 : vector<1x16x16x4xf32> to vector<256x4xf32>
    %c0_3 = arith.constant 0 : index
    %c0_4 = arith.constant 0 : index
    %2 = vector.load %arg2[%c0_3, %c0_4] : memref<4x128xf32, #tpu.memory_space<vmem>>, vector<4x128xf32>
    %cst = arith.constant dense<0.000000e+00> : vector<256x128xf32>
    %3 = tpu.matmul %1, %2, %cst {dimension_numbers = #tpu.dot_dimension_numbers<[1], [0], [0], [1], [0, 0, 1, 1], [], []>} : vector<256x4xf32>, vector<4x128xf32>, vector<256x128xf32> -> vector<256x128xf32>
    %c0_5 = arith.constant 0 : index
    %c0_6 = arith.constant 0 : index
    %4 = vector.load %arg3[%c0_5, %c0_6] : memref<1x128xf32, #tpu.memory_space<vmem>>, vector<1x128xf32>
    %5 = vector.broadcast %4 : vector<1x128xf32> to vector<256x128xf32>
    %6 = arith.addf %3, %5 : vector<256x128xf32>
    %cst_7 = arith.constant 0.000000e+00 : f32
    %7 = vector.broadcast %cst_7 : f32 to vector<256x128xf32>
    %8 = arith.maximumf %6, %7 : vector<256x128xf32>
    %cst_8 = arith.constant 0.000000e+00 : f32
    %9 = vector.broadcast %cst_8 : f32 to vector<18x18x128xf32>
    %c0_9 = arith.constant 0 : index
    %c0_10 = arith.constant 0 : index
    %c0_11 = arith.constant 0 : index
    %10 = vector.load %arg9[%c0_9, %c0_10, %c0_11] : memref<18x18x128xf32, #tpu.memory_space<vmem>>, vector<18x18x128xf32>
    tpu.vector_store %arg9[%c0_9, %c0_10, %c0_11], %9 {strides = array<i32>} : memref<18x18x128xf32, #tpu.memory_space<vmem>>, vector<18x18x128xf32>,
    %11 = vector.shape_cast %8 : vector<256x128xf32> to vector<16x16x128xf32>
    %c1 = arith.constant 1 : index
    %c1_12 = arith.constant 1 : index
    %c0_13 = arith.constant 0 : index
    %12 = vector.load %arg9[%c1, %c1_12, %c0_13] : memref<18x18x128xf32, #tpu.memory_space<vmem>>, vector<16x16x128xf32>
    tpu.vector_store %arg9[%c1, %c1_12, %c0_13], %11 {strides = array<i32>} : memref<18x18x128xf32, #tpu.memory_space<vmem>>, vector<16x16x128xf32>,
    %c0_14 = arith.constant 0 : index
    %c0_15 = arith.constant 0 : index
    %13 = vector.load %arg4[%c0_14, %c0_15] : memref<9x128xf32, #tpu.memory_space<vmem>>, vector<9x128xf32>
    %c0_16 = arith.constant 0 : index
    %c0_17 = arith.constant 0 : index
    %c0_18 = arith.constant 0 : index
    %14 = vector.load %arg9[%c0_16, %c0_17, %c0_18] : memref<18x18x128xf32, #tpu.memory_space<vmem>>, vector<16x16x128xf32>
    %15 = vector.extract_strided_slice %13 {offsets = [0, 0], sizes = [1, 128], strides = [1, 1]} : vector<9x128xf32> to vector<1x128xf32>
    %16 = vector.shape_cast %15 : vector<1x128xf32> to vector<128xf32>
    %17 = vector.shape_cast %16 : vector<128xf32> to vector<1x1x128xf32>
    %18 = vector.broadcast %17 : vector<1x1x128xf32> to vector<16x16x128xf32>
    %19 = arith.mulf %14, %18 : vector<16x16x128xf32>
    %c0_19 = arith.constant 0 : index
    %c1_20 = arith.constant 1 : index
    %c0_21 = arith.constant 0 : index
    %20 = vector.load %arg9[%c0_19, %c1_20, %c0_21] : memref<18x18x128xf32, #tpu.memory_space<vmem>>, vector<16x16x128xf32>
    %21 = vector.extract_strided_slice %13 {offsets = [1, 0], sizes = [1, 128], strides = [1, 1]} : vector<9x128xf32> to vector<1x128xf32>
    %22 = vector.shape_cast %21 : vector<1x128xf32> to vector<128xf32>
    %23 = vector.shape_cast %22 : vector<128xf32> to vector<1x1x128xf32>
    %24 = vector.broadcast %23 : vector<1x1x128xf32> to vector<16x16x128xf32>
    %25 = arith.mulf %20, %24 : vector<16x16x128xf32>
    %26 = arith.addf %19, %25 : vector<16x16x128xf32>
    %c0_22 = arith.constant 0 : index
    %c2 = arith.constant 2 : index
    %c0_23 = arith.constant 0 : index
    %27 = vector.load %arg9[%c0_22, %c2, %c0_23] : memref<18x18x128xf32, #tpu.memory_space<vmem>>, vector<16x16x128xf32>
    %28 = vector.extract_strided_slice %13 {offsets = [2, 0], sizes = [1, 128], strides = [1, 1]} : vector<9x128xf32> to vector<1x128xf32>
    %29 = vector.shape_cast %28 : vector<1x128xf32> to vector<128xf32>
    %30 = vector.shape_cast %29 : vector<128xf32> to vector<1x1x128xf32>
    %31 = vector.broadcast %30 : vector<1x1x128xf32> to vector<16x16x128xf32>
    %32 = arith.mulf %27, %31 : vector<16x16x128xf32>
    %33 = arith.addf %26, %32 : vector<16x16x128xf32>
    %c1_24 = arith.constant 1 : index
    %c0_25 = arith.constant 0 : index
    %c0_26 = arith.constant 0 : index
    %34 = vector.load %arg9[%c1_24, %c0_25, %c0_26] : memref<18x18x128xf32, #tpu.memory_space<vmem>>, vector<16x16x128xf32>
    %35 = vector.extract_strided_slice %13 {offsets = [3, 0], sizes = [1, 128], strides = [1, 1]} : vector<9x128xf32> to vector<1x128xf32>
    %36 = vector.shape_cast %35 : vector<1x128xf32> to vector<128xf32>
    %37 = vector.shape_cast %36 : vector<128xf32> to vector<1x1x128xf32>
    %38 = vector.broadcast %37 : vector<1x1x128xf32> to vector<16x16x128xf32>
    %39 = arith.mulf %34, %38 : vector<16x16x128xf32>
    %40 = arith.addf %33, %39 : vector<16x16x128xf32>
    %c1_27 = arith.constant 1 : index
    %c1_28 = arith.constant 1 : index
    %c0_29 = arith.constant 0 : index
    %41 = vector.load %arg9[%c1_27, %c1_28, %c0_29] : memref<18x18x128xf32, #tpu.memory_space<vmem>>, vector<16x16x128xf32>
    %42 = vector.extract_strided_slice %13 {offsets = [4, 0], sizes = [1, 128], strides = [1, 1]} : vector<9x128xf32> to vector<1x128xf32>
    %43 = vector.shape_cast %42 : vector<1x128xf32> to vector<128xf32>
    %44 = vector.shape_cast %43 : vector<128xf32> to vector<1x1x128xf32>
    %45 = vector.broadcast %44 : vector<1x1x128xf32> to vector<16x16x128xf32>
    %46 = arith.mulf %41, %45 : vector<16x16x128xf32>
    %47 = arith.addf %40, %46 : vector<16x16x128xf32>
    %c1_30 = arith.constant 1 : index
    %c2_31 = arith.constant 2 : index
    %c0_32 = arith.constant 0 : index
    %48 = vector.load %arg9[%c1_30, %c2_31, %c0_32] : memref<18x18x128xf32, #tpu.memory_space<vmem>>, vector<16x16x128xf32>
    %49 = vector.extract_strided_slice %13 {offsets = [5, 0], sizes = [1, 128], strides = [1, 1]} : vector<9x128xf32> to vector<1x128xf32>
    %50 = vector.shape_cast %49 : vector<1x128xf32> to vector<128xf32>
    %51 = vector.shape_cast %50 : vector<128xf32> to vector<1x1x128xf32>
    %52 = vector.broadcast %51 : vector<1x1x128xf32> to vector<16x16x128xf32>
    %53 = arith.mulf %48, %52 : vector<16x16x128xf32>
    %54 = arith.addf %47, %53 : vector<16x16x128xf32>
    %c2_33 = arith.constant 2 : index
    %c0_34 = arith.constant 0 : index
    %c0_35 = arith.constant 0 : index
    %55 = vector.load %arg9[%c2_33, %c0_34, %c0_35] : memref<18x18x128xf32, #tpu.memory_space<vmem>>, vector<16x16x128xf32>
    %56 = vector.extract_strided_slice %13 {offsets = [6, 0], sizes = [1, 128], strides = [1, 1]} : vector<9x128xf32> to vector<1x128xf32>
    %57 = vector.shape_cast %56 : vector<1x128xf32> to vector<128xf32>
    %58 = vector.shape_cast %57 : vector<128xf32> to vector<1x1x128xf32>
    %59 = vector.broadcast %58 : vector<1x1x128xf32> to vector<16x16x128xf32>
    %60 = arith.mulf %55, %59 : vector<16x16x128xf32>
    %61 = arith.addf %54, %60 : vector<16x16x128xf32>
    %c2_36 = arith.constant 2 : index
    %c1_37 = arith.constant 1 : index
    %c0_38 = arith.constant 0 : index
    %62 = vector.load %arg9[%c2_36, %c1_37, %c0_38] : memref<18x18x128xf32, #tpu.memory_space<vmem>>, vector<16x16x128xf32>
    %63 = vector.extract_strided_slice %13 {offsets = [7, 0], sizes = [1, 128], strides = [1, 1]} : vector<9x128xf32> to vector<1x128xf32>
    %64 = vector.shape_cast %63 : vector<1x128xf32> to vector<128xf32>
    %65 = vector.shape_cast %64 : vector<128xf32> to vector<1x1x128xf32>
    %66 = vector.broadcast %65 : vector<1x1x128xf32> to vector<16x16x128xf32>
    %67 = arith.mulf %62, %66 : vector<16x16x128xf32>
    %68 = arith.addf %61, %67 : vector<16x16x128xf32>
    %c2_39 = arith.constant 2 : index
    %c2_40 = arith.constant 2 : index
    %c0_41 = arith.constant 0 : index
    %69 = vector.load %arg9[%c2_39, %c2_40, %c0_41] : memref<18x18x128xf32, #tpu.memory_space<vmem>>, vector<16x16x128xf32>
    %70 = vector.extract_strided_slice %13 {offsets = [8, 0], sizes = [1, 128], strides = [1, 1]} : vector<9x128xf32> to vector<1x128xf32>
    %71 = vector.shape_cast %70 : vector<1x128xf32> to vector<128xf32>
    %72 = vector.shape_cast %71 : vector<128xf32> to vector<1x1x128xf32>
    %73 = vector.broadcast %72 : vector<1x1x128xf32> to vector<16x16x128xf32>
    %74 = arith.mulf %69, %73 : vector<16x16x128xf32>
    %75 = arith.addf %68, %74 : vector<16x16x128xf32>
    %c0_42 = arith.constant 0 : index
    %c0_43 = arith.constant 0 : index
    %76 = vector.load %arg5[%c0_42, %c0_43] : memref<1x128xf32, #tpu.memory_space<vmem>>, vector<1x128xf32>
    %77 = vector.shape_cast %76 : vector<1x128xf32> to vector<1x1x128xf32>
    %78 = vector.broadcast %77 : vector<1x1x128xf32> to vector<16x16x128xf32>
    %79 = arith.addf %75, %78 : vector<16x16x128xf32>
    %cst_44 = arith.constant 0.000000e+00 : f32
    %80 = vector.broadcast %cst_44 : f32 to vector<16x16x128xf32>
    %81 = arith.maximumf %79, %80 : vector<16x16x128xf32>
    %82 = vector.shape_cast %81 : vector<16x16x128xf32> to vector<256x128xf32>
    %c0_45 = arith.constant 0 : index
    %c0_46 = arith.constant 0 : index
    %83 = vector.load %arg6[%c0_45, %c0_46] : memref<128x4xf32, #tpu.memory_space<vmem>>, vector<128x4xf32>
    %cst_47 = arith.constant dense<0.000000e+00> : vector<256x4xf32>
    %84 = tpu.matmul %82, %83, %cst_47 {dimension_numbers = #tpu.dot_dimension_numbers<[1], [0], [0], [1], [0, 0, 1, 1], [], []>} : vector<256x128xf32>, vector<128x4xf32>, vector<256x4xf32> -> vector<256x4xf32>
    %c0_48 = arith.constant 0 : index
    %c0_49 = arith.constant 0 : index
    %85 = vector.load %arg7[%c0_48, %c0_49] : memref<1x4xf32, #tpu.memory_space<vmem>>, vector<1x4xf32>
    %86 = vector.broadcast %85 : vector<1x4xf32> to vector<256x4xf32>
    %87 = arith.addf %84, %86 : vector<256x4xf32>
    %88 = arith.addf %87, %1 : vector<256x4xf32>
    %89 = vector.shape_cast %88 : vector<256x4xf32> to vector<1x16x16x4xf32>
    %c0_50 = arith.constant 0 : index
    %c0_51 = arith.constant 0 : index
    %c0_52 = arith.constant 0 : index
    %c0_53 = arith.constant 0 : index
    %90 = vector.load %arg8[%c0_50, %c0_51, %c0_52, %c0_53] : memref<1x16x16x4xf32, #tpu.memory_space<vmem>>, vector<1x16x16x4xf32>
    tpu.vector_store %arg8[%c0_50, %c0_51, %c0_52, %c0_53], %89 {strides = array<i32>} : memref<1x16x16x4xf32, #tpu.memory_space<vmem>>, vector<1x16x16x4xf32>,
    return
  }
  func.func @transform_0(%arg0: i32) -> (i32, i32, i32, i32) {
    %c0_i32 = arith.constant 0 : i32
    %c0_i32_0 = arith.constant 0 : i32
    %c0_i32_1 = arith.constant 0 : i32
    %c0_i32_2 = arith.constant 0 : i32
    return %arg0, %c0_i32, %c0_i32_0, %c0_i32_1 : i32, i32, i32, i32
  }
  func.func @transform_1(%arg0: i32) -> (i32, i32) {
    %c0_i32 = arith.constant 0 : i32
    %c0_i32_0 = arith.constant 0 : i32
    %c0_i32_1 = arith.constant 0 : i32
    return %c0_i32, %c0_i32_0 : i32, i32
  }
  func.func @transform_2(%arg0: i32) -> (i32, i32) {
    %c0_i32 = arith.constant 0 : i32
    %c0_i32_0 = arith.constant 0 : i32
    %c0_i32_1 = arith.constant 0 : i32
    return %c0_i32, %c0_i32_0 : i32, i32
  }
  func.func @transform_3(%arg0: i32) -> (i32, i32) {
    %c0_i32 = arith.constant 0 : i32
    %c0_i32_0 = arith.constant 0 : i32
    %c0_i32_1 = arith.constant 0 : i32
    return %c0_i32, %c0_i32_0 : i32, i32
  }
  func.func @transform_4(%arg0: i32) -> (i32, i32) {
    %c0_i32 = arith.constant 0 : i32
    %c0_i32_0 = arith.constant 0 : i32
    %c0_i32_1 = arith.constant 0 : i32
    return %c0_i32, %c0_i32_0 : i32, i32
  }
  func.func @transform_5(%arg0: i32) -> (i32, i32) {
    %c0_i32 = arith.constant 0 : i32
    %c0_i32_0 = arith.constant 0 : i32
    %c0_i32_1 = arith.constant 0 : i32
    return %c0_i32, %c0_i32_0 : i32, i32
  }
  func.func @transform_6(%arg0: i32) -> (i32, i32) {
    %c0_i32 = arith.constant 0 : i32
    %c0_i32_0 = arith.constant 0 : i32
    %c0_i32_1 = arith.constant 0 : i32
    return %c0_i32, %c0_i32_0 : i32, i32
  }
  func.func @transform_7(%arg0: i32) -> (i32, i32, i32, i32) {
    %c0_i32 = arith.constant 0 : i32
    %c0_i32_0 = arith.constant 0 : i32
    %c0_i32_1 = arith.constant 0 : i32
    %c0_i32_2 = arith.constant 0 : i32
    return %arg0, %c0_i32, %c0_i32_0, %c0_i32_1 : i32, i32, i32, i32
  }
}

</mosaic_0001>

<bundles_post_ra>
// kernel: aligned_sup_val_cell_forward.1
= control target key start
LH: loop header
LB: loop body
LE: loop exit
PB: predicated region body
PF: predicated region fallthrough
CT: control target
= control target key end

     0   :  { %s1990_s24 = smov 0   ;;  %s3107_s0 = inlined_call_operand.vmem [shape: f32[2,16,16,4], index: 0, kind: input, shape index: {}]   ;;  %s3108_s1 = inlined_call_operand.vmem [shape: f32[4,128], index: 1, kind: input, shape index: {}]   ;;  %s3109_s2 = inlined_call_operand.vmem [shape: f32[1,128], index: 2, kind: input, shape index: {}]   ;;  %s3110_s3 = inlined_call_operand.vmem [shape: f32[9,128], index: 3, kind: input, shape index: {}]   ;;  %s3111_s4 = inlined_call_operand.vmem [shape: f32[1,128], index: 4, kind: input, shape index: {}]   ;;  %s3112_s5 = inlined_call_operand.vmem [shape: f32[128,4], index: 5, kind: input, shape index: {}]   ;;  %s3113_s6 = inlined_call_operand.vmem [shape: f32[1,4], index: 6, kind: input, shape index: {}]   ;;  %s3114_s7 = inlined_call_operand.vmem [shape: f32[2,16,16,4], index: 7, kind: output, shape index: {}]  }
   0x1 LB: > { %s1813_s25 = sadd.s32 4294967295, %s1947_s24   ;;  %p1817_p0 = scmp.ge.s32.totalorder %s1947_s24, 1  ;;  %s1947_s24 = sphi %s1990_s24, %s17_s24  }
   0x2   : > { %p237_p1 = scmp.lt.s32.totalorder %s1947_s24, 3 }
   0x4   : > { %p238_p2 = pnand %p1817_p0, %p237_p1 }
   0x6   : > { %241 = sbr.rel (%p238_p2) target bundleno = 548 (0x224), region = 48 }
   0xb   : > { %v311_v0 = vld [vmem:[%s3108_s1] sm:$0xf]  ;;  %vm413_vm0 = vcmask 1043456   ;;  %p269_p3 = scmp.lt.s32.totalorder %s1813_s25, 1  ;;  %vm316_vm1 = vcmask 31744   ;;  %v1949_v20 = vmov 0.0  }
   0xc   : > { %1822 = vmatpush.msk.msra.mxu0 %vm413_vm0, %v311_v0  ;;  %1859 = vmatpush.msk.msra.mxu3 %vm413_vm0, %v311_v0  ;;  %565 = vst [vmem:[#allocation2 + $0x18] sm:$0xff] %v1949_v20  ;;  %v1576_v25 = vld [vmem:[%s3112_s5 + $0x78] sm:$0xff]  ;;  %v1575_v26 = vld [vmem:[%s3112_s5 + $0x70] sm:$0xff]  ;;  %v1574_v28 = vld [vmem:[%s3112_s5 + $0x68] sm:$0xff] }
   0xd   : > { %s3136_s25 = smov (!%p269_p3, %s1813_s25), 1  ;;  %566 = vst [vmem:[#allocation2 + $0x20] sm:$0xff] %v1949_v20  ;;  %1581 = vmatpush.msra.mxu1 %v1576_v25  ;;  %1860 = vmatpush.msra.mxu2 %v1576_v25  ;;  %v1573_v29 = vld [vmem:[%s3112_s5 + $0x60] sm:$0xff]  ;;  %v1572_v31 = vld [vmem:[%s3112_s5 + $0x58] sm:$0xff]  ;;  %v1571_v35 = vld [vmem:[%s3112_s5 + $0x50] sm:$0xff] }
   0xe   : > { %s1857_s28 = sshll.u32 %s3136_s25, 8  ;;  %562 = vst [vmem:[#allocation2] sm:$0xff] %v1949_v20  ;;  %1861 = vmatpush.msrb.mxu3 %v1576_v25  ;;  %v2102_v30 = vld [vmem:[%s3109_s2] ss:$0 sm:$0xff]  ;;  %v1570_v37 = vld [vmem:[%s3112_s5 + $0x48] sm:$0xff]  ;;  %v1568_v40 = vld [vmem:[%s3112_s5 + $0x38] sm:$0xff] }
   0xf   : > { %s2009_s8 = scalar_lea.vmem %s3107_s0, %s1857_s28  ;;  %563 = vst [vmem:[#allocation2 + $0x8] sm:$0xff] %v1949_v20  ;;  %1582 = vmatpush.msra.mxu1 %v1575_v26  ;;  %1862 = vmatpush.msra.mxu2 %v1575_v26  ;;  %v1569_v39 = vld [vmem:[%s3112_s5 + $0x40] sm:$0xff]  ;;  %v1567_v44 = vld [vmem:[%s3112_s5 + $0x30] sm:$0xff]  ;;  %v1566_v45 = vld [vmem:[%s3112_s5 + $0x28] sm:$0xff]  ;;  %s2771_s21 = scalar_lea.vmem %s3114_s7, %s1857_s28 }
  0x10   : > { %v279_v1 = vld [vmem:[%s2009_s8] sm:$0xff]  ;;  %v280_v2 = vld [vmem:[%s2009_s8 + $0x8] sm:$0xff]  ;;  %v281_v3 = vld [vmem:[%s2009_s8 + $0x10] sm:$0xff]  ;;  %564 = vst [vmem:[#allocation2 + $0x10] sm:$0x3] %v1949_v20  ;;  %1863 = vmatpush.msrb.mxu3 %v1575_v26 }
  0x11   : > { %1823 = vmatmul.msk.f32.vlgmr.msra.gmra.mxu0 %vm316_vm1, %v279_v1  ;;  %v282_v4 = vld [vmem:[%s2009_s8 + $0x18] sm:$0xff]  ;;  %v283_v5 = vld [vmem:[%s2009_s8 + $0x20] sm:$0xff]  ;;  %v284_v6 = vld [vmem:[%s2009_s8 + $0x28] sm:$0xff]  ;;  %567 = vst [vmem:[#allocation2 + $0x28] sm:$0x3] %v1949_v20  ;;  %1583 = vmatpush.msra.mxu1 %v1574_v28 }
  0x12   : > { %v285_v7 = vld [vmem:[%s2009_s8 + $0x30] sm:$0xff]  ;;  %v286_v9 = vld [vmem:[%s2009_s8 + $0x38] sm:$0xff]  ;;  %v287_v11 = vld [vmem:[%s2009_s8 + $0x40] sm:$0xff]  ;;  %568 = vst [vmem:[#allocation2 + $0x30] sm:$0xff] %v1949_v20  ;;  %1864 = vmatpush.msra.mxu2 %v1574_v28  ;;  %1865 = vmatpush.msrb.mxu3 %v1574_v28 }
  0x13   : > { %v297_v8 = vld [vmem:[%s2009_s8 + $0x90] sm:$0xff]  ;;  %v298_v10 = vld [vmem:[%s2009_s8 + $0x98] sm:$0xff]  ;;  %v299_v12 = vld [vmem:[%s2009_s8 + $0xa0] sm:$0xff]  ;;  %569 = vst [vmem:[#allocation2 + $0x38] sm:$0xff] %v1949_v20  ;;  %1584 = vmatpush.msra.mxu1 %v1573_v29 }
  0x14   : > { %1841 = vmatmul.msk.f32.vlgmr.msra.gmra.mxu3 %vm316_vm1, %v297_v8  ;;  %v288_v13 = vld [vmem:[%s2009_s8 + $0x48] sm:$0xff]  ;;  %v289_v15 = vld [vmem:[%s2009_s8 + $0x50] sm:$0xff]  ;;  %v290_v17 = vld [vmem:[%s2009_s8 + $0x58] sm:$0xff]  ;;  %570 = vst [vmem:[#allocation2 + $0x40] sm:$0x3] %v1949_v20  ;;  %1866 = vmatpush.msra.mxu2 %v1573_v29 }
  0x15   : > { %v300_v14 = vld [vmem:[%s2009_s8 + $0xa8] sm:$0xff]  ;;  %v301_v16 = vld [vmem:[%s2009_s8 + $0xb0] sm:$0xff]  ;;  %v302_v18 = vld [vmem:[%s2009_s8 + $0xb8] sm:$0xff]  ;;  %571 = vst [vmem:[#allocation2 + $0x48] sm:$0xff] %v1949_v20  ;;  %1585 = vmatpush.msra.mxu1 %v1572_v31  ;;  %1867 = vmatpush.msrb.mxu3 %v1573_v29 }
  0x16   : > { %v291_v19 = vld [vmem:[%s2009_s8 + $0x60] sm:$0xff]  ;;  %v292_v21 = vld [vmem:[%s2009_s8 + $0x68] sm:$0xff]  ;;  %572 = vst [vmem:[#allocation2 + $0x50] sm:$0xff] %v1949_v20  ;;  %v293_v22 = vld [vmem:[%s2009_s8 + $0x70] sm:$0xff]  ;;  %1868 = vmatpush.msra.mxu2 %v1572_v31 }
  0x17   : > { %573 = vst [vmem:[#allocation2 + $0x58] sm:$0x3] %v1949_v20  ;;  %v303_v23 = vld [vmem:[%s2009_s8 + $0xc0] sm:$0xff]  ;;  %v294_v24 = vld [vmem:[%s2009_s8 + $0x78] sm:$0xff]  ;;  %v304_v27 = vld [vmem:[%s2009_s8 + $0xc8] sm:$0xff]  ;;  %1586 = vmatpush.msra.mxu1 %v1571_v35  ;;  %1869 = vmatpush.msrb.mxu3 %v1572_v31 }
  0x18   : > { %574 = vst [vmem:[#allocation2 + $0x60] sm:$0xff] %v1949_v20  ;;  %v305_v32 = vld [vmem:[%s2009_s8 + $0xd0] sm:$0xff]  ;;  %v295_v34 = vld [vmem:[%s2009_s8 + $0x80] sm:$0xff]  ;;  %1870 = vmatpush.msra.mxu2 %v1571_v35  ;;  %v306_v41 = vld [vmem:[%s2009_s8 + $0xd8] sm:$0xff] }
  0x19   : > { %1824 = vmatmul.msk.f32.gmra.mxu0 %vm316_vm1, %v280_v2  ;;  %575 = vst [vmem:[#allocation2 + $0x68] sm:$0xff] %v1949_v20  ;;  %1587 = vmatpush.msra.mxu1 %v1570_v37  ;;  %v296_v43 = vld [vmem:[%s2009_s8 + $0x88] sm:$0xff]  ;;  %v2152_v46 = vld [vmem:[%s3110_s3] sm:$0xff]  ;;  %v1564_v50 = vld [vmem:[%s3112_s5 + $0x18] sm:$0xff] }
  0x1a   : > { %576 = vst [vmem:[#allocation2 + $0x70] sm:$0x3] %v1949_v20  ;;  %1872 = vmatpush.msra.mxu2 %v1570_v37  ;;  %1871 = vmatpush.msrb.mxu3 %v1571_v35  ;;  %v2157_v47 = vperm.slane %v2152_v46, 0  ;;  %v1565_v48 = vld [vmem:[%s3112_s5 + $0x20] sm:$0xff]  ;;  %v2169_v51 = vperm.slane %v2152_v46, 1  ;;  %v1563_v56 = vld [vmem:[%s3112_s5 + $0x10] sm:$0xff] }
  0x1b   : > { %577 = vst [vmem:[#allocation2 + $0x78] sm:$0xff] %v1949_v20  ;;  %1588 = vmatpush.msra.mxu1 %v1569_v39  ;;  %v716_v49 = vld [vmem:[#allocation2 + $0x1] sm:$0xff]  ;;  %v2181_v58 = vperm.slane %v2152_v46, 2  ;;  %v717_v62 = vld [vmem:[#allocation2 + $0x9] sm:$0xff]  ;;  %v2233_v29 = vperm.slane %v2152_v46, 7 }
  0x1c   : > { %1842 = vmatmul.msk.f32.gmra.mxu3 %vm316_vm1, %v298_v10  ;;  %578 = vst [vmem:[#allocation2 + $0x80] sm:$0xff] %v1949_v20  ;;  %1874 = vmatpush.msra.mxu2 %v1569_v39  ;;  %v307_v52 = vld [vmem:[%s2009_s8 + $0xe0] sm:$0xff]  ;;  %v684_v53 = vmul.f32 0.0, %v2157_v47  ;;  %v749_v57 = vmul.f32 %v2169_v51, %v716_v49  ;;  %v1562_v61 = vld [vmem:[%s3112_s5 + $0x8] sm:$0xff] }
  0x1d   : > { %579 = vst [vmem:[#allocation2 + $0x88] sm:$0x3] %v1949_v20  ;;  %1589 = vmatpush.msra.mxu1 %v1568_v40  ;;  %1873 = vmatpush.msrb.mxu3 %v1570_v37  ;;  %v813_v60 = vld [vmem:[#allocation2 + $0x2] sm:$0xff]  ;;  %v814_v8 = vld [vmem:[#allocation2 + $0xa] sm:$0xff] }
  0x1e   : > { %580 = vst [vmem:[#allocation2 + $0x90] sm:$0xff] %v1949_v20  ;;  %1876 = vmatpush.msra.mxu2 %v1568_v40  ;;  %v1561_v0 = vld [vmem:[%s3112_s5] sm:$0xff]  ;;  %v781_v1 = vadd.f32 %v749_v57, %v684_v53  ;;  %v846_v2 = vmul.f32 %v2181_v58, %v813_v60 }
  0x1f   : > { %581 = vst [vmem:[#allocation2 + $0x98] sm:$0xff] %v1949_v20  ;;  %1590 = vmatpush.msra.mxu1 %v1567_v44  ;;  %1875 = vmatpush.msrb.mxu3 %v1569_v39 }
  0x20   : > { %582 = vst [vmem:[#allocation2 + $0xa0] sm:$0x3] %v1949_v20  ;;  %1878 = vmatpush.msra.mxu2 %v1567_v44  ;;  %v878_v10 = vadd.f32 %v846_v2, %v781_v1 }
  0x21   : > { %1825 = vmatmul.msk.f32.gmra.mxu0 %vm316_vm1, %v281_v3  ;;  %583 = vst [vmem:[#allocation2 + $0xa8] sm:$0xff] %v1949_v20  ;;  %1591 = vmatpush.msra.mxu1 %v1566_v45  ;;  %v2199_v3 = vperm.slane %v2152_v46, 3 }
  0x22   : > { %584 = vst [vmem:[#allocation2 + $0xb0] sm:$0xff] %v1949_v20  ;;  %1880 = vmatpush.msra.mxu2 %v1566_v45  ;;  %1877 = vmatpush.msrb.mxu3 %v1568_v40 }
  0x23   : > { %585 = vst [vmem:[#allocation2 + $0xb8] sm:$0x3] %v1949_v20  ;;  %1592 = vmatpush.msra.mxu1 %v1565_v48 }
  0x24   : > { %1843 = vmatmul.msk.f32.gmra.mxu3 %vm316_vm1, %v299_v12  ;;  %586 = vst [vmem:[#allocation2 + $0xc0] sm:$0xff] %v1949_v20  ;;  %1882 = vmatpush.msra.mxu2 %v1565_v48 }
  0x25   : > { %587 = vst [vmem:[#allocation2 + $0xc8] sm:$0xff] %v1949_v20  ;;  %1593 = vmatpush.msra.mxu1 %v1564_v50  ;;  %1879 = vmatpush.msrb.mxu3 %v1567_v44 }
  0x26   : > { %588 = vst [vmem:[#allocation2 + $0xd0] sm:$0x3] %v1949_v20  ;;  %1884 = vmatpush.msra.mxu2 %v1564_v50 }
  0x27   : > { %589 = vst [vmem:[#allocation2 + $0xd8] sm:$0xff] %v1949_v20  ;;  %1594 = vmatpush.msra.mxu1 %v1563_v56  ;;  %1881 = vmatpush.msrb.mxu3 %v1566_v45 }
  0x28   : > { %590 = vst [vmem:[#allocation2 + $0xe0] sm:$0xff] %v1949_v20  ;;  %1886 = vmatpush.msra.mxu2 %v1563_v56 }
  0x29   : > { %1826 = vmatmul.msk.f32.gmra.mxu0 %vm316_vm1, %v282_v4  ;;  %591 = vst [vmem:[#allocation2 + $0xe8] sm:$0x3] %v1949_v20  ;;  %1595 = vmatpush.msra.mxu1 %v1562_v61 }
  0x2a   : > { %592 = vst [vmem:[#allocation2 + $0xf0] sm:$0xff] %v1949_v20  ;;  %1888 = vmatpush.msra.mxu2 %v1562_v61  ;;  %1883 = vmatpush.msrb.mxu3 %v1565_v48 }
  0x2b   : > { %593 = vst [vmem:[#allocation2 + $0xf8] sm:$0xff] %v1949_v20  ;;  %1596 = vmatpush.msra.mxu1 %v1561_v0 }
  0x2c   : > { %1844 = vmatmul.msk.f32.gmra.mxu3 %vm316_vm1, %v300_v14  ;;  %594 = vst [vmem:[#allocation2 + $0x100] sm:$0x3] %v1949_v20  ;;  %1890 = vmatpush.msra.mxu2 %v1561_v0 }
  0x2d   : > { %595 = vst [vmem:[#allocation2 + $0x108] sm:$0xff] %v1949_v20  ;;  %1885 = vmatpush.msrb.mxu3 %v1564_v50 }
  0x2e   : > { %596 = vst [vmem:[#allocation2 + $0x110] sm:$0xff] %v1949_v20 }
  0x2f   : > { %597 = vst [vmem:[#allocation2 + $0x118] sm:$0x3] %v1949_v20  ;;  %1887 = vmatpush.msrb.mxu3 %v1563_v56 }
  0x30   : > { %598 = vst [vmem:[#allocation2 + $0x120] sm:$0xff] %v1949_v20 }
  0x31   : > { %1827 = vmatmul.msk.f32.gmra.mxu0 %vm316_vm1, %v283_v5  ;;  %599 = vst [vmem:[#allocation2 + $0x128] sm:$0xff] %v1949_v20  ;;  %1889 = vmatpush.msrb.mxu3 %v1562_v61 }
  0x32   : > { %600 = vst [vmem:[#allocation2 + $0x130] sm:$0x3] %v1949_v20 }
  0x33   : > { %601 = vst [vmem:[#allocation2 + $0x138] sm:$0xff] %v1949_v20  ;;  %1891 = vmatpush.msrb.mxu3 %v1561_v0 }
  0x34   : > { %1845 = vmatmul.msk.f32.gmra.mxu3 %vm316_vm1, %v301_v16  ;;  %602 = vst [vmem:[#allocation2 + $0x140] sm:$0xff] %v1949_v20 }
  0x35   : > { %603 = vst [vmem:[#allocation2 + $0x148] sm:$0x3] %v1949_v20 }
  0x36   : > { %604 = vst [vmem:[#allocation2 + $0x150] sm:$0xff] %v1949_v20 }
  0x37   : > { %605 = vst [vmem:[#allocation2 + $0x158] sm:$0xff] %v1949_v20 }
  0x38   : > { %606 = vst [vmem:[#allocation2 + $0x160] sm:$0x3] %v1949_v20 }
  0x39   : > { %1828 = vmatmul.msk.f32.gmra.mxu0 %vm316_vm1, %v284_v6  ;;  %3125 = vst [vmem:[#allocation3_spill] sm:$0xff] %v2169_v51  ;;  %v750_v6 = vmul.f32 %v2169_v51, %v717_v62 }
  0x3a   : > { %607 = vst [vmem:[#allocation2 + $0x168] sm:$0xff] %v1949_v20 }
  0x3b   : > { %608 = vst [vmem:[#allocation2 + $0x170] sm:$0xff] %v1949_v20  ;;  %v782_v14 = vadd.f32 %v750_v6, %v684_v53 }
  0x3c   : > { %1846 = vmatmul.msk.f32.gmra.mxu3 %vm316_vm1, %v302_v18  ;;  %609 = vst [vmem:[#allocation2 + $0x178] sm:$0x3] %v1949_v20  ;;  %v2220_v18 = vperm.slane %v2152_v46, 5 }
  0x3d   : > { %610 = vst [vmem:[#allocation2 + $0x180] sm:$0xff] %v1949_v20 }
  0x3e   : > { %611 = vst [vmem:[#allocation2 + $0x188] sm:$0xff] %v1949_v20 }
  0x3f   : > { %612 = vst [vmem:[#allocation2 + $0x190] sm:$0x3] %v1949_v20 }
  0x40   : > { %613 = vst [vmem:[#allocation2 + $0x198] sm:$0xff] %v1949_v20 }
  0x41   : > { %1829 = vmatmul.msk.f32.gmra.mxu0 %vm316_vm1, %v285_v7  ;;  %614 = vst [vmem:[#allocation2 + $0x1a0] sm:$0xff] %v1949_v20  ;;  %v308_v7 = vld [vmem:[%s2009_s8 + $0xe8] sm:$0xff] }
  0x42   : > { %615 = vst [vmem:[#allocation2 + $0x1a8] sm:$0x3] %v1949_v20 }
  0x44   : > { %1847 = vmatmul.msk.f32.gmra.mxu3 %vm316_vm1, %v303_v23 }
  0x49   : > { %1830 = vmatmul.msk.f32.gmra.mxu0 %vm316_vm1, %v286_v9 }
  0x4c   : > { %1848 = vmatmul.msk.f32.gmra.mxu3 %vm316_vm1, %v304_v27 }
  0x51   : > { %1831 = vmatmul.msk.f32.gmra.mxu0 %vm316_vm1, %v287_v11 }
  0x54   : > { %1849 = vmatmul.msk.f32.gmra.mxu3 %vm316_vm1, %v305_v32 }
  0x59   : > { %1832 = vmatmul.msk.f32.gmra.mxu0 %vm316_vm1, %v288_v13  ;;  %v2213_v13 = vperm.slane %v2152_v46, 4 }
  0x5c   : > { %1850 = vmatmul.msk.f32.gmra.mxu3 %vm316_vm1, %v306_v41 }
  0x61   : > { %1833 = vmatmul.msk.f32.gmra.mxu0 %vm316_vm1, %v289_v15  ;;  %v847_v15 = vmul.f32 %v2181_v58, %v814_v8 }
  0x64   : > { %1851 = vmatmul.msk.f32.gmra.mxu3 %vm316_vm1, %v307_v52 }
  0x69   : > { %1834 = vmatmul.msk.f32.gmra.mxu0 %vm316_vm1, %v290_v17 }
  0x6c   : > { %1852 = vmatmul.msk.f32.gmra.mxu3 %vm316_vm1, %v308_v7 }
  0x71   : > { %1835 = vmatmul.msk.f32.gmra.mxu0 %vm316_vm1, %v291_v19  ;;  %v2224_v19 = vperm.slane %v2152_v46, 6 }
  0x79   : > { %1836 = vmatmul.msk.f32.gmra.mxu0 %vm316_vm1, %v292_v21  ;;  %v879_v21 = vadd.f32 %v847_v15, %v782_v14 }
  0x81   : > { %1837 = vmatmul.msk.f32.gmra.mxu0 %vm316_vm1, %v293_v22 }
  0x89   : > { %1838 = vmatmul.msk.f32.gmra.mxu0 %vm316_vm1, %v294_v24  ;;  %v309_v24 = vld [vmem:[%s2009_s8 + $0xf0] sm:$0xff] }
  0x8a   : > { %1853 = vmatmul.msk.f32.gmra.mxu3 %vm316_vm1, %v309_v24 }
  0x8e   : > { %v434_v33 = vpop.f32.mrf.mxu0 }
  0x8f   : > { %v435_v36 = vadd.f32 %v2102_v30, %v434_v33 }
  0x91   : > { %v2123_v38 = vmax.f32 %v435_v36, 0.0  ;;  %1839 = vmatmul.msk.f32.gmra.mxu0 %vm316_vm1, %v295_v34  ;;  %v2242_v34 = vld [vmem:[%s3110_s3 + $0x8] ss:$0 sm:$0xff] }
  0x93   : > { %617 = vst [vmem:[#allocation2 + $0x19] sm:$0xff] %v2123_v38  ;;  %v1040_v20 = vmul.f32 %v2213_v13, %v2123_v38  ;;  %v751_v41 = vmul.f32 %v2169_v51, %v2123_v38 }
  0x96   : > { %v437_v42 = vpop.f32.mrf.mxu0 }
  0x97   : > { %v438_v54 = vadd.f32 %v2102_v30, %v437_v42 }
  0x99   : > { %1840 = vmatmul.msk.f32.gmra.mxu0 %vm316_vm1, %v296_v43  ;;  %v2192_v63 = vmax.f32 %v438_v54, 0.0 }
  0x9a   : > { %v910_v5 = vld [vmem:[#allocation2 + $0x18] sm:$0xff] }
  0x9b   : > { %618 = vst [vmem:[#allocation2 + $0x21] sm:$0xff] %v2192_v63  ;;  %v943_v11 = vmul.f32 %v2199_v3, %v910_v5  ;;  %v686_v36 = vmul.f32 %v910_v5, %v2157_v47  ;;  %v1041_v40 = vmul.f32 %v2213_v13, %v2192_v63  ;;  %v752_v45 = vmul.f32 %v2169_v51, %v2192_v63  ;;  %v310_v63 = vld [vmem:[%s2009_s8 + $0xf8] sm:$0xff] }
  0x9c   : > { %1854 = vmatmul.msk.f32.gmra.mxu3 %vm316_vm1, %v310_v63 }
  0x9d   : > { %v975_v17 = vadd.f32 %v943_v11, %v878_v10 }
  0x9e   : > { %v440_v55 = vpop.f32.mrf.mxu0 }
  0x9f   : > { %v441_v59 = vadd.f32 %v2102_v30, %v440_v55  ;;  %v1072_v26 = vadd.f32 %v1040_v20, %v975_v17  ;;  %v783_v55 = vadd.f32 %v751_v41, %v686_v36 }
  0xa1   : > { %v2202_v4 = vmax.f32 %v441_v59, 0.0  ;;  %v2267_v59 = vld [vmem:[%s3111_s4] ss:$0 sm:$0xff] }
  0xa2   : > { %v1104_v22 = vld [vmem:[#allocation2 + $0x1a] sm:$0xff]  ;;  %v1105_v35 = vld [vmem:[#allocation2 + $0x22] sm:$0xff] }
  0xa3   : > { %619 = vst [vmem:[#allocation2 + $0x31] sm:$0xff] %v2202_v4  ;;  %v911_v23 = vld [vmem:[#allocation2 + $0x20] sm:$0xff]  ;;  %v1137_v27 = vmul.f32 %v2220_v18, %v1104_v22  ;;  %v848_v43 = vmul.f32 %v1104_v22, %v2181_v58  ;;  %v1332_v48 = vmul.f32 %v2233_v29, %v2202_v4  ;;  %v1138_v52 = vmul.f32 %v2220_v18, %v1105_v35 }
  0xa4   : > { %v944_v31 = vmul.f32 %v2199_v3, %v911_v23  ;;  %v687_v44 = vmul.f32 %v911_v23, %v2157_v47  ;;  %v1042_v17 = vmul.f32 %v2213_v13, %v2202_v4  ;;  %v753_v41 = vmul.f32 %v2169_v51, %v2202_v4 }
  0xa5   : > { %v1169_v37 = vadd.f32 %v1137_v27, %v1072_v26  ;;  %v880_v62 = vadd.f32 %v848_v43, %v783_v55 }
  0xa6   : > { %v443_v9 = vpop.f32.mrf.mxu0  ;;  %v976_v39 = vadd.f32 %v944_v31, %v879_v21  ;;  %v784_v0 = vadd.f32 %v752_v45, %v687_v44 }
  0xa7   : > { %v444_v12 = vadd.f32 %v2102_v30, %v443_v9  ;;  %v849_v9 = vmul.f32 %v1105_v35, %v2181_v58 }
  0xa8   : > { %v1073_v50 = vadd.f32 %v1041_v40, %v976_v39 }
  0xa9   : > { %v2217_v16 = vmax.f32 %v444_v12, 0.0  ;;  %v881_v21 = vadd.f32 %v849_v9, %v784_v0 }
  0xaa   : > { %v2230_v28 = vld [vmem:[#allocation2 + $0x30] sm:$0xff]  ;;  %v1170_v60 = vadd.f32 %v1138_v52, %v1073_v50 }
  0xab   : > { %620 = vst [vmem:[#allocation2 + $0x39] sm:$0xff] %v2217_v16  ;;  %v1235_v33 = vmul.f32 %v2224_v19, %v2230_v28  ;;  %v945_v56 = vmul.f32 %v2230_v28, %v2199_v3  ;;  %v1333_v6 = vmul.f32 %v2233_v29, %v2217_v16  ;;  %v688_v36 = vmul.f32 %v2230_v28, %v2157_v47 }
  0xac   : > { %v754_v4 = vmul.f32 %v2169_v51, %v2217_v16 }
  0xad   : > { %v1267_v46 = vadd.f32 %v1235_v33, %v1169_v37  ;;  %v977_v8 = vadd.f32 %v945_v56, %v880_v62 }
  0xae   : > { %v446_v25 = vpop.f32.mrf.mxu0 }
  0xaf   : > { %v447_v32 = vadd.f32 %v2102_v30, %v446_v25  ;;  %v1364_v57 = vadd.f32 %v1332_v48, %v1267_v46  ;;  %v1074_v25 = vadd.f32 %v1042_v17, %v977_v8 }
  0xb1   : > { %v2250_v42 = vmax.f32 %v447_v32, 0.0  ;;  %v1043_v32 = vmul.f32 %v2213_v13, %v2217_v16 }
  0xb2   : > { %v1396_v49 = vld [vmem:[#allocation2 + $0x32] sm:$0xff]  ;;  %v1397_v61 = vld [vmem:[#allocation2 + $0x3a] sm:$0xff] }
  0xb3   : > { %v1203_v53 = vld [vmem:[#allocation2 + $0x38] sm:$0xff]  ;;  %621 = vst [vmem:[#allocation2 + $0x49] sm:$0xff] %v2250_v42  ;;  %v1429_v38 = vmul.f32 %v2242_v34, %v1396_v49  ;;  %v1430_v14 = vmul.f32 %v2242_v34, %v1397_v61  ;;  %v1139_v20 = vmul.f32 %v1396_v49, %v2220_v18  ;;  %v850_v43 = vmul.f32 %v1396_v49, %v2181_v58 }
  0xb4   : > { %v1236_v54 = vmul.f32 %v2224_v19, %v1203_v53  ;;  %v946_v10 = vmul.f32 %v1203_v53, %v2199_v3  ;;  %v1334_v45 = vmul.f32 %v2233_v29, %v2250_v42  ;;  %v1140_v46 = vmul.f32 %v1397_v61, %v2220_v18 }
  0xb5   : > { %v1461_v2 = vadd.f32 %v1429_v38, %v1364_v57  ;;  %v1171_v31 = vadd.f32 %v1139_v20, %v1074_v25  ;;  %v689_v48 = vmul.f32 %v1203_v53, %v2157_v47  ;;  %v785_v38 = vadd.f32 %v753_v41, %v688_v36 }
  0xb6   : > { %v449_v1 = vpop.f32.mrf.mxu0  ;;  %v1268_v5 = vadd.f32 %v1236_v54, %v1170_v60  ;;  %v978_v27 = vadd.f32 %v946_v10, %v881_v21  ;;  %v851_v16 = vmul.f32 %v1397_v61, %v2181_v58 }
  0xb7   : > { %v450_v7 = vadd.f32 %v2102_v30, %v449_v1  ;;  %v1497_v11 = vadd.f32 %v2267_v59, %v1461_v2  ;;  %v882_v53 = vadd.f32 %v850_v43, %v785_v38  ;;  %v786_v1 = vadd.f32 %v754_v4, %v689_v48 }
  0xb8   : > { %v1365_v12 = vadd.f32 %v1333_v6, %v1268_v5  ;;  %v1075_v40 = vadd.f32 %v1043_v32, %v978_v27  ;;  %v755_v43 = vmul.f32 %v2169_v51, %v2250_v42 }
  0xb9   : > { %v2278_v15 = vmax.f32 %v450_v7, 0.0  ;;  %v1529_v22 = vmax.f32 %v1497_v11, 0.0  ;;  %v1044_v11 = vmul.f32 %v2213_v13, %v2250_v42  ;;  %v883_v20 = vadd.f32 %v851_v16, %v786_v1 }
  0xba   : > { %v1462_v23 = vadd.f32 %v1430_v14, %v1365_v12  ;;  %v2283_v24 = vld [vmem:[#allocation2 + $0x48] sm:$0xff]  ;;  %v1172_v56 = vadd.f32 %v1140_v46, %v1075_v40 }
  0xbb   : > { %622 = vst [vmem:[#allocation2 + $0x51] sm:$0xff] %v2278_v15  ;;  %v1237_v26 = vmul.f32 %v2224_v19, %v2283_v24  ;;  %1597 = vmatmul.f32.vlgmr.msra.gmra.mxu1 %v1529_v22  ;;  %v947_v54 = vmul.f32 %v2283_v24, %v2199_v3  ;;  %v1335_v63 = vmul.f32 %v2233_v29, %v2278_v15 }
  0xbc   : > { %v1498_v35 = vadd.f32 %v2267_v59, %v1462_v23  ;;  %v690_v36 = vmul.f32 %v2283_v24, %v2157_v47 }
  0xbd   : > { %v1269_v39 = vadd.f32 %v1237_v26, %v1171_v31  ;;  %v979_v5 = vadd.f32 %v947_v54, %v882_v53  ;;  %v488_v26 = vpop.f32.mrf.mxu3  ;;  %v1045_v31 = vmul.f32 %v2213_v13, %v2278_v15 }
  0xbe   : > { %v452_v33 = vpop.f32.mrf.mxu0  ;;  %v1530_v50 = vmax.f32 %v1498_v35, 0.0  ;;  %v489_v32 = vadd.f32 %v2102_v30, %v488_v26 }
  0xbf   : > { %v453_v37 = vadd.f32 %v2102_v30, %v452_v33  ;;  %v1366_v49 = vadd.f32 %v1334_v45, %v1269_v39  ;;  %v1076_v22 = vadd.f32 %v1044_v11, %v979_v5 }
  0xc0   : > { %v2334_v41 = vmax.f32 %v489_v32, 0.0 }
  0xc1   : > { %v2297_v44 = vmax.f32 %v453_v37, 0.0 }
  0xc2   : > { %v1398_v28 = vld [vmem:[#allocation2 + $0x4a] sm:$0xff]  ;;  %v1399_v0 = vld [vmem:[#allocation2 + $0x52] sm:$0xff]  ;;  %635 = vst [vmem:[#allocation2 + $0xf1] sm:$0xff] %v2334_v41 }
  0xc3   : > { %v1205_v52 = vld [vmem:[#allocation2 + $0x50] sm:$0xff]  ;;  %623 = vst [vmem:[#allocation2 + $0x61] sm:$0xff] %v2297_v44  ;;  %v1431_v55 = vmul.f32 %v2242_v34, %v1398_v28  ;;  %1600 = vmatmul.f32.gmra.mxu1 %v1530_v50  ;;  %v1432_v10 = vmul.f32 %v2242_v34, %v1399_v0  ;;  %v1141_v17 = vmul.f32 %v1398_v28, %v2220_v18 }
  0xc4   : > { %v1238_v57 = vmul.f32 %v2224_v19, %v1205_v52  ;;  %v948_v9 = vmul.f32 %v1205_v52, %v2199_v3  ;;  %v852_v45 = vmul.f32 %v1398_v28, %v2181_v58  ;;  %v691_v46 = vmul.f32 %v1205_v52, %v2157_v47 }
  0xc5   : > { %v1463_v60 = vadd.f32 %v1431_v55, %v1366_v49  ;;  %v1173_v27 = vadd.f32 %v1141_v17, %v1076_v22  ;;  %v1336_v50 = vmul.f32 %v2233_v29, %v2297_v44  ;;  %v1142_v24 = vmul.f32 %v1399_v0, %v2220_v18 }
  0xc6   : > { %v1270_v62 = vadd.f32 %v1238_v57, %v1172_v56  ;;  %v455_v2 = vpop.f32.mrf.mxu0  ;;  %v980_v25 = vadd.f32 %v948_v9, %v883_v20  ;;  %v787_v49 = vadd.f32 %v755_v43, %v690_v36  ;;  %v756_v28 = vmul.f32 %v2169_v51, %v2278_v15 }
  0xc7   : > { %v456_v6 = vadd.f32 %v2102_v30, %v455_v2  ;;  %v1499_v7 = vadd.f32 %v2267_v59, %v1463_v60  ;;  %v1046_v20 = vmul.f32 %v2213_v13, %v2297_v44 }
  0xc8   : > { %v1367_v8 = vadd.f32 %v1335_v63, %v1270_v62  ;;  %v1077_v40 = vadd.f32 %v1045_v31, %v980_v25  ;;  %v884_v53 = vadd.f32 %v852_v45, %v787_v49  ;;  %v788_v60 = vadd.f32 %v756_v28, %v691_v46  ;;  %v491_v62 = vpop.f32.mrf.mxu3 }
  0xc9   : > { %v2319_v12 = vmax.f32 %v456_v6, 0.0  ;;  %v1531_v14 = vmax.f32 %v1499_v7, 0.0  ;;  %v492_v15 = vadd.f32 %v2102_v30, %v491_v62  ;;  %v853_v7 = vmul.f32 %v1399_v0, %v2181_v58 }
  0xca   : > { %v1464_v21 = vadd.f32 %v1432_v10, %v1367_v8  ;;  %v2322_v61 = vld [vmem:[#allocation2 + $0x60] sm:$0xff]  ;;  %v1174_v56 = vadd.f32 %v1142_v24, %v1077_v40 }
  0xcb   : > { %624 = vst [vmem:[#allocation2 + $0x69] sm:$0xff] %v2319_v12  ;;  %v1239_v23 = vmul.f32 %v2224_v19, %v2322_v61  ;;  %1603 = vmatmul.f32.gmra.mxu1 %v1531_v14  ;;  %v949_v42 = vmul.f32 %v2322_v61, %v2199_v3  ;;  %v1337_v2 = vmul.f32 %v2233_v29, %v2319_v12  ;;  %v2362_v14 = vmax.f32 %v492_v15, 0.0 }
  0xcc   : > { %v1500_v35 = vadd.f32 %v2267_v59, %v1464_v21  ;;  %v1047_v36 = vmul.f32 %v2213_v13, %v2319_v12  ;;  %v692_v43 = vmul.f32 %v2322_v61, %v2157_v47 }
  0xcd   : > { %v1271_v39 = vadd.f32 %v1239_v23, %v1173_v27  ;;  %v981_v6 = vadd.f32 %v949_v42, %v884_v53  ;;  %v885_v23 = vadd.f32 %v853_v7, %v788_v60  ;;  %636 = vst [vmem:[#allocation2 + $0xf9] sm:$0xff] %v2362_v14 }
  0xce   : > { %v458_v33 = vpop.f32.mrf.mxu0  ;;  %v1532_v38 = vmax.f32 %v1500_v35, 0.0 }
  0xcf   : > { %v459_v37 = vadd.f32 %v2102_v30, %v458_v33  ;;  %v1368_v52 = vadd.f32 %v1336_v50, %v1271_v39  ;;  %v1078_v27 = vadd.f32 %v1046_v20, %v981_v6 }
  0xd0   : > { %v494_v33 = vpop.f32.mrf.mxu3 }
  0xd1   : > { %v2340_v48 = vmax.f32 %v459_v37, 0.0  ;;  %v495_v37 = vadd.f32 %v2102_v30, %v494_v33 }
  0xd2   : > { %v1400_v54 = vld [vmem:[#allocation2 + $0x62] sm:$0xff]  ;;  %v2355_v5 = vld [vmem:[#allocation2 + $0x6a] sm:$0xff] }
  0xd3   : > { %v1207_v4 = vld [vmem:[#allocation2 + $0x68] sm:$0xff]  ;;  %625 = vst [vmem:[#allocation2 + $0x79] sm:$0xff] %v2340_v48  ;;  %v1433_v55 = vmul.f32 %v2242_v34, %v1400_v54  ;;  %1606 = vmatmul.f32.gmra.mxu1 %v1532_v38  ;;  %v1434_v17 = vmul.f32 %v2242_v34, %v2355_v5  ;;  %v1143_v0 = vmul.f32 %v1400_v54, %v2220_v18  ;;  %v2384_v24 = vmax.f32 %v495_v37, 0.0 }
  0xd4   : > { %v1240_v57 = vmul.f32 %v2224_v19, %v1207_v4  ;;  %v950_v8 = vmul.f32 %v1207_v4, %v2199_v3  ;;  %v757_v38 = vmul.f32 %v2169_v51, %v2297_v44  ;;  %v854_v49 = vmul.f32 %v1400_v54, %v2181_v58 }
  0xd5   : > { %v1465_v63 = vadd.f32 %v1433_v55, %v1368_v52  ;;  %v1175_v35 = vadd.f32 %v1143_v0, %v1078_v27  ;;  %v693_v42 = vmul.f32 %v1207_v4, %v2157_v47  ;;  %v1338_v52 = vmul.f32 %v2233_v29, %v2340_v48  ;;  %637 = vst [vmem:[#allocation2 + $0x109] sm:$0xff] %v2384_v24 }
  0xd6   : > { %v1272_v1 = vadd.f32 %v1240_v57, %v1174_v56  ;;  %v461_v16 = vpop.f32.mrf.mxu0  ;;  %v982_v32 = vadd.f32 %v950_v8, %v885_v23  ;;  %v1144_v61 = vmul.f32 %v2355_v5, %v2220_v18  ;;  %v789_v53 = vadd.f32 %v757_v38, %v692_v43 }
  0xd7   : > { %v462_v9 = vadd.f32 %v2102_v30, %v461_v16  ;;  %v1501_v10 = vadd.f32 %v2267_v59, %v1465_v63  ;;  %v758_v54 = vmul.f32 %v2169_v51, %v2319_v12  ;;  %v1048_v27 = vmul.f32 %v2213_v13, %v2340_v48 }
  0xd8   : > { %v1369_v11 = vadd.f32 %v1337_v2, %v1272_v1  ;;  %v1079_v50 = vadd.f32 %v1047_v36, %v982_v32  ;;  %v886_v1 = vadd.f32 %v854_v49, %v789_v53  ;;  %v497_v15 = vpop.f32.mrf.mxu3 }
  0xd9   : > { %v2368_v21 = vmax.f32 %v462_v9, 0.0  ;;  %v1533_v22 = vmax.f32 %v1501_v10, 0.0  ;;  %v790_v2 = vadd.f32 %v758_v54, %v693_v42  ;;  %v498_v12 = vadd.f32 %v2102_v30, %v497_v15 }
  0xda   : > { %v1466_v25 = vadd.f32 %v1434_v17, %v1369_v11  ;;  %v2372_v26 = vld [vmem:[#allocation2 + $0x78] sm:$0xff]  ;;  %v1176_v62 = vadd.f32 %v1144_v61, %v1079_v50  ;;  %v855_v11 = vmul.f32 %v2355_v5, %v2181_v58 }
  0xdb   : > { %626 = vst [vmem:[#allocation2 + $0x81] sm:$0xff] %v2368_v21  ;;  %v1241_v31 = vmul.f32 %v2224_v19, %v2372_v26  ;;  %1609 = vmatmul.f32.gmra.mxu1 %v1533_v22  ;;  %v951_v44 = vmul.f32 %v2372_v26, %v2199_v3  ;;  %v1339_v7 = vmul.f32 %v2233_v29, %v2368_v21  ;;  %v2414_v23 = vmax.f32 %v498_v12, 0.0 }
  0xdc   : > { %v1502_v40 = vadd.f32 %v2267_v59, %v1466_v25  ;;  %v887_v33 = vadd.f32 %v855_v11, %v790_v2  ;;  %v694_v42 = vmul.f32 %v2372_v26, %v2157_v47 }
  0xdd   : > { %v1273_v46 = vadd.f32 %v1241_v31, %v1175_v35  ;;  %v983_v10 = vadd.f32 %v951_v44, %v886_v1  ;;  %638 = vst [vmem:[#allocation2 + $0x111] sm:$0xff] %v2414_v23  ;;  %v759_v44 = vmul.f32 %v2169_v51, %v2340_v48 }
  0xde   : > { %v464_v39 = vpop.f32.mrf.mxu0  ;;  %v1534_v55 = vmax.f32 %v1502_v40, 0.0 }
  0xdf   : > { %v465_v45 = vadd.f32 %v2102_v30, %v464_v39  ;;  %v1370_v4 = vadd.f32 %v1338_v52, %v1273_v46  ;;  %v1080_v37 = vadd.f32 %v1048_v27, %v983_v10  ;;  %v1049_v46 = vmul.f32 %v2213_v13, %v2368_v21 }
  0xe0   : > { %v500_v43 = vpop.f32.mrf.mxu3  ;;  %v791_v15 = vadd.f32 %v759_v44, %v694_v42 }
  0xe1   : > { %v2390_v28 = vmax.f32 %v465_v45, 0.0  ;;  %v501_v50 = vadd.f32 %v2102_v30, %v500_v43 }
  0xe2   : > { %v1402_v56 = vld [vmem:[#allocation2 + $0x7a] sm:$0xff]  ;;  %v2406_v8 = vld [vmem:[#allocation2 + $0x82] sm:$0xff] }
  0xe3   : > { %v1209_v57 = vld [vmem:[#allocation2 + $0x80] sm:$0xff]  ;;  %627 = vst [vmem:[#allocation2 + $0x91] sm:$0xff] %v2390_v28  ;;  %v1435_v60 = vmul.f32 %v2242_v34, %v1402_v56  ;;  %1612 = vmatmul.f32.gmra.mxu1 %v1534_v55  ;;  %v1436_v25 = vmul.f32 %v2242_v34, %v2406_v8  ;;  %v1145_v5 = vmul.f32 %v1402_v56, %v2220_v18  ;;  %v2436_v53 = vmax.f32 %v501_v50, 0.0 }
  0xe4   : > { %v1242_v63 = vmul.f32 %v2224_v19, %v1209_v57  ;;  %v952_v17 = vmul.f32 %v1209_v57, %v2199_v3  ;;  %v856_v54 = vmul.f32 %v1402_v56, %v2181_v58  ;;  %v1146_v26 = vmul.f32 %v2406_v8, %v2220_v18 }
  0xe5   : > { %v1467_v16 = vadd.f32 %v1435_v60, %v1370_v4  ;;  %v1177_v45 = vadd.f32 %v1145_v5, %v1080_v37  ;;  %v695_v4 = vmul.f32 %v1209_v57, %v2157_v47  ;;  %639 = vst [vmem:[#allocation2 + $0x121] sm:$0xff] %v2436_v53  ;;  %v760_v56 = vmul.f32 %v2169_v51, %v2368_v21 }
  0xe6   : > { %v1274_v6 = vadd.f32 %v1242_v63, %v1176_v62  ;;  %v467_v9 = vpop.f32.mrf.mxu0  ;;  %v984_v40 = vadd.f32 %v952_v17, %v887_v33  ;;  %v1340_v62 = vmul.f32 %v2233_v29, %v2390_v28  ;;  %v888_v12 = vadd.f32 %v856_v54, %v791_v15 }
  0xe7   : > { %v468_v20 = vadd.f32 %v2102_v30, %v467_v9  ;;  %v1503_v22 = vadd.f32 %v2267_v59, %v1467_v16  ;;  %v792_v9 = vadd.f32 %v760_v56, %v695_v4  ;;  %v857_v27 = vmul.f32 %v2406_v8, %v2181_v58 }
  0xe8   : > { %v1371_v0 = vadd.f32 %v1339_v7, %v1274_v6  ;;  %v1081_v55 = vadd.f32 %v1049_v46, %v984_v40  ;;  %v503_v10 = vpop.f32.mrf.mxu3  ;;  %v1050_v46 = vmul.f32 %v2213_v13, %v2390_v28  ;;  %v761_v54 = vmul.f32 %v2169_v51, %v2390_v28 }
  0xe9   : > { %v2420_v31 = vmax.f32 %v468_v20, 0.0  ;;  %v1535_v32 = vmax.f32 %v1503_v22, 0.0  ;;  %v504_v21 = vadd.f32 %v2102_v30, %v503_v10  ;;  %v889_v40 = vadd.f32 %v857_v27, %v792_v9 }
  0xea   : > { %v1468_v35 = vadd.f32 %v1436_v25, %v1371_v0  ;;  %v2424_v36 = vld [vmem:[#allocation2 + $0x90] sm:$0xff]  ;;  %v1178_v6 = vadd.f32 %v1146_v26, %v1081_v55 }
  0xeb   : > { %628 = vst [vmem:[#allocation2 + $0x99] sm:$0xff] %v2420_v31  ;;  %v1243_v39 = vmul.f32 %v2224_v19, %v2424_v36  ;;  %1615 = vmatmul.f32.gmra.mxu1 %v1535_v32  ;;  %v953_v48 = vmul.f32 %v2424_v36, %v2199_v3  ;;  %v1341_v20 = vmul.f32 %v2233_v29, %v2420_v31  ;;  %v2464_v37 = vmax.f32 %v504_v21, 0.0 }
  0xec   : > { %v1504_v49 = vadd.f32 %v2267_v59, %v1468_v35  ;;  %v1051_v55 = vmul.f32 %v2213_v13, %v2420_v31 }
  0xed   : > { %v1275_v61 = vadd.f32 %v1243_v39, %v1177_v45  ;;  %v985_v25 = vadd.f32 %v953_v48, %v888_v12  ;;  %640 = vst [vmem:[#allocation2 + $0x129] sm:$0xff] %v2464_v37 }
  0xee   : > { %v470_v38 = vpop.f32.mrf.mxu0  ;;  %v1536_v63 = vmax.f32 %v1504_v49, 0.0 }
  0xef   : > { %v471_v52 = vadd.f32 %v2102_v30, %v470_v38  ;;  %v1372_v57 = vadd.f32 %v1340_v62, %v1275_v61  ;;  %v1082_v42 = vadd.f32 %v1050_v46, %v985_v25  ;;  %v696_v61 = vmul.f32 %v2424_v36, %v2157_v47 }
  0xf0   : > { %v506_v25 = vpop.f32.mrf.mxu3 }
  0xf1   : > { %v2442_v60 = vmax.f32 %v471_v52, 0.0  ;;  %v793_v36 = vadd.f32 %v761_v54, %v696_v61  ;;  %v507_v27 = vadd.f32 %v2102_v30, %v506_v25 }
  0xf2   : > { %v1404_v1 = vld [vmem:[#allocation2 + $0x92] sm:$0xff]  ;;  %v1405_v22 = vld [vmem:[#allocation2 + $0x9a] sm:$0xff] }
  0xf3   : > { %v1211_v2 = vld [vmem:[#allocation2 + $0x98] sm:$0xff]  ;;  %629 = vst [vmem:[#allocation2 + $0xa9] sm:$0xff] %v2442_v60  ;;  %v1437_v16 = vmul.f32 %v2242_v34, %v1404_v1  ;;  %1618 = vmatmul.f32.gmra.mxu1 %v1536_v63  ;;  %v1438_v39 = vmul.f32 %v2242_v34, %v1405_v22  ;;  %v1147_v8 = vmul.f32 %v1404_v1, %v2220_v18 }
  0xf4   : > { %v1244_v7 = vmul.f32 %v2224_v19, %v1211_v2  ;;  %v954_v32 = vmul.f32 %v1211_v2, %v2199_v3  ;;  %v858_v4 = vmul.f32 %v1404_v1, %v2181_v58  ;;  %v697_v15 = vmul.f32 %v1211_v2, %v2157_v47 }
  0xf5   : > { %v1469_v11 = vadd.f32 %v1437_v16, %v1372_v57  ;;  %v1179_v44 = vadd.f32 %v1147_v8, %v1082_v42  ;;  %v1148_v57 = vmul.f32 %v1405_v22, %v2220_v18  ;;  %v762_v16 = vmul.f32 %v2169_v51, %v2420_v31  ;;  %v2509_v8 = vld [vmem:[#allocation2 + $0xf2] sm:$0xff] }
  0xf6   : > { %v1276_v17 = vadd.f32 %v1244_v7, %v1178_v6  ;;  %v473_v0 = vpop.f32.mrf.mxu0  ;;  %v986_v49 = vadd.f32 %v954_v32, %v889_v40  ;;  %v1342_v28 = vmul.f32 %v2233_v29, %v2442_v60  ;;  %v890_v1 = vadd.f32 %v858_v4, %v793_v36  ;;  %v2492_v7 = vld [vmem:[#allocation2 + $0xf0] sm:$0xff] }
  0xf7   : > { %v474_v5 = vadd.f32 %v2102_v30, %v473_v0  ;;  %v1505_v33 = vadd.f32 %v2267_v59, %v1469_v11  ;;  %v1052_v11 = vmul.f32 %v2213_v13, %v2442_v60  ;;  %v859_v32 = vmul.f32 %v1405_v22, %v2181_v58 }
  0xf8   : > { %v1373_v35 = vadd.f32 %v1341_v20, %v1276_v17  ;;  %v1083_v63 = vadd.f32 %v1051_v55, %v986_v49  ;;  %v794_v17 = vadd.f32 %v762_v16, %v697_v15  ;;  %v2511_v49 = vmax.f32 %v507_v27, 0.0 }
  0xf9   : > { %v2467_v43 = vmax.f32 %v474_v5, 0.0  ;;  %v1537_v45 = vmax.f32 %v1505_v33, 0.0  ;;  %v704_v5 = vmul.f32 %v2492_v7, %v2157_v47  ;;  %v769_v33 = vmul.f32 %v2169_v51, %v2334_v41 }
  0xfa   : > { %v1470_v50 = vadd.f32 %v1438_v39, %v1373_v35  ;;  %v1212_v38 = vld [vmem:[#allocation2 + $0xa8] sm:$0xff]  ;;  %v1180_v2 = vadd.f32 %v1148_v57, %v1083_v63  ;;  %3126 = vst [vmem:[#allocation4_spill] sm:$0xff] %v2511_v49  ;;  %v891_v22 = vadd.f32 %v859_v32, %v794_v17  ;;  %v866_v63 = vmul.f32 %v2509_v8, %v2181_v58  ;;  %v509_v17 = vpop.f32.mrf.mxu3 }
  0xfb   : > { %630 = vst [vmem:[#allocation2 + $0xb1] sm:$0xff] %v2467_v43  ;;  %v1245_v52 = vmul.f32 %v2224_v19, %v1212_v38  ;;  %1621 = vmatmul.f32.gmra.mxu1 %v1537_v45  ;;  %v955_v0 = vmul.f32 %v1212_v38, %v2199_v3  ;;  %v1343_v40 = vmul.f32 %v2233_v29, %v2467_v43 }
  0xfc   : > { %v1506_v26 = vadd.f32 %v2267_v59, %v1470_v50  ;;  %v698_v42 = vmul.f32 %v1212_v38, %v2157_v47  ;;  %641 = vst [vmem:[#allocation2 + $0x139] sm:$0xff] %v2511_v49  ;;  %v1053_v16 = vmul.f32 %v2213_v13, %v2467_v43 }
  0xfd   : > { %v1277_v56 = vadd.f32 %v1245_v52, %v1179_v44  ;;  %v763_v52 = vmul.f32 %v2169_v51, %v2442_v60  ;;  %v987_v54 = vadd.f32 %v955_v0, %v890_v1  ;;  %v2532_v1 = vmul.f32 %v2233_v29, %v2334_v41 }
  0xfe   : > { %v476_v62 = vpop.f32.mrf.mxu0  ;;  %v1538_v12 = vmax.f32 %v1506_v26, 0.0  ;;  %v801_v26 = vadd.f32 %v769_v33, %v704_v5 }
  0xff   : > { %v477_v48 = vadd.f32 %v2102_v30, %v476_v62  ;;  %v1374_v20 = vadd.f32 %v1342_v28, %v1277_v56  ;;  %v2524_v56 = vld [vmem:[#allocation2 + $0x108] sm:$0xff]  ;;  %v764_v28 = vmul.f32 %v2169_v51, %v2467_v43 }
 0x100   : > { %v898_v43 = vadd.f32 %v866_v63, %v801_v26  ;;  %v963_v0 = vmul.f32 %v2524_v56, %v2199_v3 }
 0x101   : > { %v2488_v6 = vmax.f32 %v477_v48, 0.0 }
 0x102   : > { %v1406_v9 = vld [vmem:[#allocation2 + $0xaa] sm:$0xff]  ;;  %v1407_v45 = vld [vmem:[#allocation2 + $0xb2] sm:$0xff] }
 0x103   : > { %v1213_v10 = vld [vmem:[#allocation2 + $0xb0] sm:$0xff]  ;;  %631 = vst [vmem:[#allocation2 + $0xc1] sm:$0xff] %v2488_v6  ;;  %v1439_v31 = vmul.f32 %v2242_v34, %v1406_v9  ;;  %1624 = vmatmul.f32.gmra.mxu1 %v1538_v12  ;;  %v1440_v4 = vmul.f32 %v2242_v34, %v1407_v45  ;;  %v1149_v62 = vmul.f32 %v1406_v9, %v2220_v18 }
 0x104   : > { %v1246_v21 = vmul.f32 %v2224_v19, %v1213_v10  ;;  %v956_v46 = vmul.f32 %v1213_v10, %v2199_v3  ;;  %v699_v60 = vmul.f32 %v1213_v10, %v2157_v47  ;;  %v1084_v12 = vadd.f32 %v1052_v11, %v987_v54 }
 0x105   : > { %v1471_v35 = vadd.f32 %v1439_v31, %v1374_v20  ;;  %v795_v10 = vadd.f32 %v763_v52, %v698_v42  ;;  %v860_v20 = vmul.f32 %v1406_v9, %v2181_v58  ;;  %v510_v31 = vadd.f32 %v2102_v30, %v509_v17 }
 0x106   : > { %v1278_v39 = vadd.f32 %v1246_v21, %v1180_v2  ;;  %v479_v50 = vpop.f32.mrf.mxu0  ;;  %v988_v48 = vadd.f32 %v956_v46, %v891_v22  ;;  %v2539_v21 = vmul.f32 %v2213_v13, %v2334_v41  ;;  %v1181_v25 = vadd.f32 %v1149_v62, %v1084_v12  ;;  %v2553_v41 = vld [vmem:[%s3109_s2] ss:$0 sm:$0xff] }
 0x107   : > { %v480_v61 = vadd.f32 %v2102_v30, %v479_v50  ;;  %v1507_v55 = vadd.f32 %v2267_v59, %v1471_v35  ;;  %v796_v32 = vadd.f32 %v764_v28, %v699_v60  ;;  %v1344_v9 = vmul.f32 %v2233_v29, %v2488_v6 }
 0x108   : > { %v1375_v44 = vadd.f32 %v1343_v40, %v1278_v39  ;;  %v1085_v27 = vadd.f32 %v1053_v16, %v988_v48  ;;  %v1150_v30 = vmul.f32 %v1407_v45, %v2220_v18  ;;  %v2548_v35 = vmax.f32 %v510_v31, 0.0  ;;  %v512_v16 = vpop.f32.mrf.mxu3 }
 0x109   : > { %v545_v38 = vmax.f32 %v480_v61, 0.0  ;;  %v1539_v15 = vmax.f32 %v1507_v55, 0.0  ;;  %v892_v46 = vadd.f32 %v860_v20, %v795_v10  ;;  %v861_v50 = vmul.f32 %v1407_v45, %v2181_v58 }
 0x10a   : > { %v1472_v36 = vadd.f32 %v1440_v4, %v1375_v44  ;;  %v1214_v57 = vld [vmem:[#allocation2 + $0xc0] sm:$0xff]  ;;  %3127 = vst [vmem:[#allocation5_spill] sm:$0xff] %v2548_v35  ;;  %v1054_v22 = vmul.f32 %v2213_v13, %v2488_v6  ;;  %v765_v52 = vmul.f32 %v2169_v51, %v2488_v6  ;;  %v2565_v61 = vmul.f32 %v2224_v19, %v2492_v7 }
 0x10b   : > { %632 = vst [vmem:[#allocation2 + $0xc9] sm:$0xff] %v545_v38  ;;  %v1247_v2 = vmul.f32 %v2224_v19, %v1214_v57  ;;  %1627 = vmatmul.f32.gmra.mxu1 %v1539_v15  ;;  %v957_v11 = vmul.f32 %v1214_v57, %v2199_v3  ;;  %v700_v42 = vmul.f32 %v1214_v57, %v2157_v47 }
 0x10c   : > { %v1508_v33 = vadd.f32 %v2267_v59, %v1472_v36  ;;  %642 = vst [vmem:[#allocation2 + $0x141] sm:$0xff] %v2548_v35  ;;  %v1182_v44 = vadd.f32 %v1150_v30, %v1085_v27  ;;  %v893_v4 = vadd.f32 %v861_v50, %v796_v32  ;;  %v1345_v63 = vmul.f32 %v2233_v29, %v545_v38  ;;  %v2588_v32 = vld [vmem:[#allocation2 + $0x120] sm:$0xff]  ;;  %v2597_v50 = vld [vmem:[#allocation2 + $0xf8] sm:$0xff] }
 0x10d   : > { %v1279_v40 = vadd.f32 %v1247_v2, %v1181_v25  ;;  %v989_v54 = vadd.f32 %v957_v11, %v892_v46  ;;  %v1055_v48 = vmul.f32 %v2213_v13, %v545_v38  ;;  %v2573_v6 = vmul.f32 %v2242_v34, %v2509_v8  ;;  %v2586_v11 = vld [vmem:[#allocation2 + $0x10a] sm:$0xff] }
 0x10e   : > { %v482_v5 = vpop.f32.mrf.mxu0  ;;  %v1540_v45 = vmax.f32 %v1508_v33, 0.0  ;;  %v766_v28 = vmul.f32 %v2169_v51, %v545_v38  ;;  %v513_v12 = vadd.f32 %v2553_v41, %v512_v16  ;;  %v797_v17 = vadd.f32 %v765_v52, %v700_v42 }
 0x10f   : > { %v483_v39 = vadd.f32 %v2553_v41, %v482_v5  ;;  %v1376_v60 = vadd.f32 %v1344_v9, %v1279_v40  ;;  %v2583_v10 = vmul.f32 %v2492_v7, %v2199_v3  ;;  %v1086_v27 = vadd.f32 %v1054_v22, %v989_v54 }
 0x110   : > { %v2591_v33 = vmax.f32 %v513_v12, 0.0  ;;  %v995_v22 = vadd.f32 %v963_v0, %v898_v43  ;;  %v1060_v42 = vmul.f32 %v2213_v13, %v2384_v24  ;;  %v1157_v52 = vmul.f32 %v2586_v11, %v2220_v18 }
 0x111   : > { %v2567_v55 = vmax.f32 %v483_v39, 0.0 }
 0x112   : > { %v1408_v62 = vld [vmem:[#allocation2 + $0xc2] sm:$0xff]  ;;  %v1409_v15 = vld [vmem:[#allocation2 + $0xca] sm:$0xff]  ;;  %3128 = vst [vmem:[#allocation6_spill] sm:$0xff] %v2591_v33 }
 0x113   : > { %v1215_v26 = vld [vmem:[#allocation2 + $0xc8] sm:$0xff]  ;;  %633 = vst [vmem:[#allocation2 + $0xd9] sm:$0xff] %v2567_v55  ;;  %v1441_v36 = vmul.f32 %v2242_v34, %v1408_v62  ;;  %1630 = vmatmul.f32.gmra.mxu1 %v1540_v45  ;;  %v1442_v25 = vmul.f32 %v2242_v34, %v1409_v15  ;;  %v1151_v5 = vmul.f32 %v1408_v62, %v2220_v18 }
 0x114   : > { %v1248_v57 = vmul.f32 %v2224_v19, %v1215_v26  ;;  %v958_v2 = vmul.f32 %v1215_v26, %v2199_v3  ;;  %v862_v30 = vmul.f32 %v1408_v62, %v2181_v58  ;;  %v701_v46 = vmul.f32 %v1215_v26, %v2157_v47  ;;  %643 = vst [vmem:[#allocation2 + $0x151] sm:$0xff] %v2591_v33 }
 0x115   : > { %v1473_v20 = vadd.f32 %v1441_v36, %v1376_v60  ;;  %v2608_v62 = vmul.f32 %v2233_v29, %v2436_v53  ;;  %v1183_v26 = vadd.f32 %v1151_v5, %v1086_v27  ;;  %v1346_v43 = vmul.f32 %v2233_v29, %v2567_v55 }
 0x116   : > { %v1280_v31 = vadd.f32 %v1248_v57, %v1182_v44  ;;  %v485_v38 = vpop.f32.mrf.mxu0  ;;  %v990_v9 = vadd.f32 %v958_v2, %v893_v4  ;;  %v1255_v44 = vmul.f32 %v2224_v19, %v2588_v32  ;;  %v705_v60 = vmul.f32 %v2597_v50, %v2157_v47  ;;  %v515_v57 = vpop.f32.mrf.mxu3 }
 0x117   : > { %v486_v7 = vadd.f32 %v2553_v41, %v485_v38  ;;  %v1509_v39 = vadd.f32 %v2267_v59, %v1473_v20  ;;  %v894_v16 = vadd.f32 %v862_v30, %v797_v17  ;;  %v798_v2 = vadd.f32 %v766_v28, %v701_v46  ;;  %v2625_v28 = vld [vmem:[#allocation2 + $0xfa] sm:$0xff] }
 0x118   : > { %v1377_v40 = vadd.f32 %v1345_v63, %v1280_v31  ;;  %v1087_v0 = vadd.f32 %v1055_v48, %v990_v9  ;;  %v1152_v31 = vmul.f32 %v1409_v15, %v2220_v18  ;;  %v1056_v5 = vmul.f32 %v2213_v13, %v2567_v55 }
 0x119   : > { %v547_v54 = vmax.f32 %v486_v7, 0.0  ;;  %v1541_v4 = vmax.f32 %v1509_v39, 0.0  ;;  %v863_v9 = vmul.f32 %v1409_v15, %v2181_v58  ;;  %v767_v7 = vmul.f32 %v2169_v51, %v2567_v55  ;;  %v2629_v39 = vld [vmem:[#allocation2 + $0x110] sm:$0xff] }
 0x11a   : > { %v1474_v45 = vadd.f32 %v1442_v25, %v1377_v40  ;;  %v1216_v63 = vld [vmem:[#allocation2 + $0xd8] sm:$0xff]  ;;  %v516_v25 = vadd.f32 %v2553_v41, %v515_v57  ;;  %v1184_v17 = vadd.f32 %v1152_v31, %v1087_v0  ;;  %v1092_v40 = vadd.f32 %v1060_v42, %v995_v22 }
 0x11b   : > { %634 = vst [vmem:[#allocation2 + $0xe1] sm:$0xff] %v547_v54  ;;  %v1249_v36 = vmul.f32 %v2224_v19, %v1216_v63  ;;  %v959_v12 = vmul.f32 %v1216_v63, %v2199_v3  ;;  %1633 = vmatmul.f32.gmra.mxu1 %v1541_v4  ;;  %v702_v48 = vmul.f32 %v1216_v63, %v2157_v47 }
 0x11c   : > { %v1510_v20 = vadd.f32 %v2267_v59, %v1474_v45  ;;  %v2623_v30 = vmax.f32 %v516_v25, 0.0  ;;  %v1347_v46 = vmul.f32 %v2233_v29, %v547_v54  ;;  %v895_v4 = vadd.f32 %v863_v9, %v798_v2 }
 0x11d   : > { %v1281_v27 = vadd.f32 %v1249_v36, %v1183_v26  ;;  %v991_v38 = vadd.f32 %v959_v12, %v894_v16  ;;  %v1057_v45 = vmul.f32 %v2213_v13, %v547_v54  ;;  %v770_v26 = vmul.f32 %v2169_v51, %v2362_v14 }
 0x11e   : > { %3129 = vst [vmem:[#allocation7_spill] sm:$0xff] %v2623_v30  ;;  %v1542_v15 = vmax.f32 %v1510_v20, 0.0  ;;  %v799_v63 = vadd.f32 %v767_v7, %v702_v48  ;;  %v768_v0 = vmul.f32 %v2169_v51, %v547_v54  ;;  %v1189_v36 = vadd.f32 %v1157_v52, %v1092_v40 }
 0x11f   : > { %644 = vst [vmem:[#allocation2 + $0x159] sm:$0xff] %v2623_v30  ;;  %v1378_v57 = vadd.f32 %v1346_v43, %v1281_v27  ;;  %v1088_v55 = vadd.f32 %v1056_v5, %v991_v38  ;;  %v867_v22 = vmul.f32 %v2625_v28, %v2181_v58  ;;  %v964_v42 = vmul.f32 %v2629_v39, %v2199_v3  ;;  %v518_v38 = vpop.f32.mrf.mxu3 }
 0x120   : > { %v1287_v31 = vadd.f32 %v1255_v44, %v1189_v36  ;;  %v802_v25 = vadd.f32 %v770_v26, %v705_v60  ;;  %v706_v20 = vmul.f32 %v2524_v56, %v2157_v47  ;;  %v771_v54 = vmul.f32 %v2169_v51, %v2384_v24 }
 0x121   : > { %v519_v5 = vadd.f32 %v2553_v41, %v518_v38 }
 0x122   : > { %v1410_v16 = vld [vmem:[#allocation2 + $0xda] sm:$0xff]  ;;  %v1411_v2 = vld [vmem:[#allocation2 + $0xe2] sm:$0xff] }
 0x123   : > { %v1217_v12 = vld [vmem:[#allocation2 + $0xe0] sm:$0xff]  ;;  %v1443_v52 = vmul.f32 %v2242_v34, %v1410_v16  ;;  %v1444_v48 = vmul.f32 %v2242_v34, %v1411_v2  ;;  %v1153_v27 = vmul.f32 %v1410_v16, %v2220_v18  ;;  %1636 = vmatmul.f32.gmra.mxu1 %v1542_v15  ;;  %v1154_v60 = vmul.f32 %v1411_v2, %v2220_v18 }
 0x124   : > { %v1250_v43 = vmul.f32 %v2224_v19, %v1217_v12  ;;  %v960_v44 = vmul.f32 %v1217_v12, %v2199_v3  ;;  %v864_v9 = vmul.f32 %v1410_v16, %v2181_v58  ;;  %v703_v36 = vmul.f32 %v1217_v12, %v2157_v47 }
 0x125   : > { %v1475_v7 = vadd.f32 %v1443_v52, %v1378_v57  ;;  %v1185_v26 = vadd.f32 %v1153_v27, %v1088_v55  ;;  %v2654_v30 = vmax.f32 %v519_v5, 0.0  ;;  %v865_v35 = vmul.f32 %v1411_v2, %v2181_v58  ;;  %v2661_v57 = vld [vmem:[#allocation2 + $0x112] sm:$0xff]  ;;  %v2668_v52 = vld [vmem:[#allocation2 + $0x128] sm:$0xff] }
 0x126   : > { %v1282_v40 = vadd.f32 %v1250_v43, %v1184_v17  ;;  %v992_v34 = vadd.f32 %v960_v44, %v895_v4  ;;  %v896_v33 = vadd.f32 %v864_v9, %v799_v63  ;;  %v800_v51 = vadd.f32 %v768_v0, %v703_v36 }
 0x127   : > { %v1511_v15 = vadd.f32 %v2267_v59, %v1475_v7  ;;  %v1283_v49 = vadd.f32 %v2565_v61, %v1185_v26  ;;  %645 = vst [vmem:[#allocation2 + $0x169] sm:$0xff] %v2654_v30  ;;  %v2664_v55 = vadd.f32 %v2608_v62, %v1287_v31  ;;  %v899_v4 = vadd.f32 %v867_v22, %v802_v25  ;;  %v521_v62 = vpop.f32.mrf.mxu3 }
 0x128   : > { %v1379_v38 = vadd.f32 %v1347_v46, %v1282_v40  ;;  %v1089_v16 = vadd.f32 %v1057_v45, %v992_v34  ;;  %v993_v17 = vadd.f32 %v2583_v10, %v896_v33  ;;  %v897_v2 = vadd.f32 %v865_v35, %v800_v51  ;;  %v1416_v40 = vld [vmem:[#allocation2 + $0x122] sm:$0xff] }
 0x129   : > { %v1543_v63 = vmax.f32 %v1511_v15, 0.0  ;;  %v1061_v46 = vmul.f32 %v2213_v13, %v2414_v23  ;;  %v1252_v45 = vmul.f32 %v2224_v19, %v2597_v50  ;;  %v962_v10 = vmul.f32 %v2597_v50, %v2199_v3 }
 0x12a   : > { %v1476_v12 = vadd.f32 %v1444_v48, %v1379_v38  ;;  %v1186_v61 = vadd.f32 %v1154_v60, %v1089_v16  ;;  %v996_v33 = vadd.f32 %v964_v42, %v899_v4  ;;  %v1090_v0 = vadd.f32 %v2539_v21, %v993_v17  ;;  %v2709_v16 = vld [vmem:[#allocation2 + $0x138] sm:$0xff] }
 0x12b   : > { %1639 = vmatmul.f32.vlgmr.msra.gmra.mxu2 %v1543_v63  ;;  %v1158_v51 = vmul.f32 %v2661_v57, %v2220_v18  ;;  %v803_v35 = vadd.f32 %v771_v54, %v706_v20  ;;  %v868_v22 = vmul.f32 %v2586_v11, %v2181_v58  ;;  %v1380_v31 = vadd.f32 %v2532_v1, %v1283_v49  ;;  %v2691_v49 = vld [vmem:[%s3110_s3 + $0x8] ss:$0 sm:$0xff]  ;;  %v739_v63 = vld [vmem:[#allocation2 + $0x111] sm:$0xff] }
 0x12c   : > { %v522_v25 = vadd.f32 %v2553_v41, %v521_v62  ;;  %v1155_v43 = vmul.f32 %v2509_v8, %v2220_v18  ;;  %v1256_v50 = vmul.f32 %v2224_v19, %v2668_v52  ;;  %v1512_v42 = vadd.f32 %v2267_v59, %v1476_v12 }
 0x12d   : > { %v1284_v21 = vadd.f32 %v1252_v45, %v1186_v61  ;;  %v994_v48 = vadd.f32 %v962_v10, %v897_v2  ;;  %v1093_v27 = vadd.f32 %v1061_v46, %v996_v33  ;;  %v1349_v20 = vmul.f32 %v2233_v29, %v2362_v14 }
 0x12e   : > { %v1446_v1 = vmul.f32 %v2691_v49, %v2625_v28  ;;  %v2695_v8 = vmax.f32 %v522_v25, 0.0  ;;  %v1059_v54 = vmul.f32 %v2213_v13, %v2362_v14  ;;  %v1187_v59 = vadd.f32 %v1155_v43, %v1090_v0 }
 0x12f   : > { %v1190_v5 = vadd.f32 %v1158_v51, %v1093_v27  ;;  %v1353_v44 = vmul.f32 %v2233_v29, %v2464_v37  ;;  %v900_v60 = vadd.f32 %v868_v22, %v803_v35  ;;  %v1477_v9 = vadd.f32 %v2573_v6, %v1380_v31  ;;  %v524_v2 = vpop.f32.mrf.mxu3  ;;  %v3130_v51 = vld [vmem:[#allocation3_spill] sm:$0xff]  ;;  %v2738_v31 = vld [vmem:[%s3113_s6] ss:$0 sm:$0xff] }
 0x130   : > { %646 = vst [vmem:[#allocation2 + $0x171] sm:$0xff] %v2695_v8  ;;  %v1253_v7 = vmul.f32 %v2224_v19, %v2524_v56  ;;  %v965_v26 = vmul.f32 %v2588_v32, %v2199_v3  ;;  %v1062_v14 = vmul.f32 %v2213_v13, %v2436_v53  ;;  %v1544_v36 = vmax.f32 %v1512_v42, 0.0  ;;  %v3131_v42 = vld [vmem:[#allocation4_spill] sm:$0xff] }
 0x131   : > { %v1381_v34 = vadd.f32 %v1349_v20, %v1284_v21  ;;  %v1091_v15 = vadd.f32 %v1059_v54, %v994_v48  ;;  %v1288_v38 = vadd.f32 %v1256_v50, %v1190_v5  ;;  %v1350_v6 = vmul.f32 %v2233_v29, %v2384_v24  ;;  %v2726_v24 = vld [vmem:[%s3111_s4] ss:$0 sm:$0xff]  ;;  %v740_v54 = vld [vmem:[#allocation2 + $0x121] sm:$0xff] }
 0x132   : > { %v1156_v17 = vmul.f32 %v2625_v28, %v2220_v18  ;;  %v997_v56 = vadd.f32 %v965_v26, %v900_v60  ;;  %v1159_v4 = vmul.f32 %v1416_v40, %v2220_v18  ;;  %v1285_v12 = vadd.f32 %v1253_v7, %v1187_v59 }
 0x133   : > { %1642 = vmatmul.f32.gmra.mxu2 %v1544_v36  ;;  %v2717_v53 = vmul.f32 %v2691_v49, %v1416_v40  ;;  %v2719_v46 = vadd.f32 %v1353_v44, %v1288_v38  ;;  %v707_v61 = vmul.f32 %v2629_v39, %v2157_v47  ;;  %v1513_v28 = vadd.f32 %v2726_v24, %v1477_v9  ;;  %v1417_v36 = vld [vmem:[#allocation2 + $0x12a] sm:$0xff] }
 0x134   : > { %v525_v45 = vadd.f32 %v2553_v41, %v524_v2  ;;  %v1094_v10 = vadd.f32 %v1062_v14, %v997_v56  ;;  %v1257_v33 = vmul.f32 %v2224_v19, %v2709_v16  ;;  %v1478_v62 = vadd.f32 %v1446_v1, %v1381_v34 }
 0x135   : > { %v1188_v0 = vadd.f32 %v1156_v17, %v1091_v15  ;;  %v772_v35 = vmul.f32 %v3130_v51, %v739_v63  ;;  %v869_v22 = vmul.f32 %v2661_v57, %v2181_v58  ;;  %v1447_v25 = vmul.f32 %v2691_v49, %v2586_v11  ;;  %v2761_v15 = vld [vmem:[#allocation2 + $0x140] sm:$0xff] }
 0x136   : > { %v2742_v43 = vmax.f32 %v525_v45, 0.0  ;;  %v1191_v50 = vadd.f32 %v1159_v4, %v1094_v10  ;;  %v1354_v21 = vmul.f32 %v2233_v29, %v3131_v42  ;;  %v1382_v48 = vadd.f32 %v1350_v6, %v1285_v12  ;;  %v1908_v4 = vld [vmem:[%s2009_s8] sm:$0xff] }
 0x137   : > { %v1254_v27 = vmul.f32 %v2224_v19, %v2629_v39  ;;  %v804_v20 = vadd.f32 %v772_v35, %v707_v61  ;;  %v966_v1 = vmul.f32 %v2668_v52, %v2199_v3  ;;  %v1545_v59 = vmax.f32 %v1513_v28, 0.0  ;;  %v527_v38 = vpop.f32.mrf.mxu3  ;;  %v741_v61 = vld [vmem:[#allocation2 + $0x129] sm:$0xff] }
 0x138   : > { %647 = vst [vmem:[#allocation2 + $0x181] sm:$0xff] %v2742_v43  ;;  %v1351_v11 = vmul.f32 %v2233_v29, %v2414_v23  ;;  %v1448_v5 = vmul.f32 %v2691_v49, %v2661_v57  ;;  %v1289_v44 = vadd.f32 %v1257_v33, %v1191_v50  ;;  %v1598_v60 = vpop.f32.mrf.mxu1  ;;  %v1514_v9 = vadd.f32 %v2726_v24, %v1478_v62  ;;  %v3132_v62 = vld [vmem:[#allocation5_spill] sm:$0xff]  ;;  %v2794_v50 = vld [vmem:[#allocation2 + $0x150] sm:$0xff] }
 0x139   : > { %v1286_v39 = vadd.f32 %v1254_v27, %v1188_v0  ;;  %v901_v7 = vadd.f32 %v869_v22, %v804_v20  ;;  %v1063_v26 = vmul.f32 %v2213_v13, %v2464_v37  ;;  %v1599_v14 = vadd.f32 %v2738_v31, %v1598_v60  ;;  %v2792_v22 = vld [vmem:[#allocation2 + $0x13a] sm:$0xff] }
 0x13a   : > { %v2759_v34 = vadd.f32 %v1354_v21, %v1289_v44  ;;  %v708_v23 = vmul.f32 %v2588_v32, %v2157_v47  ;;  %v773_v57 = vmul.f32 %v3130_v51, %v740_v54  ;;  %v1479_v37 = vadd.f32 %v1447_v25, %v1382_v48 }
 0x13b   : > { %1645 = vmatmul.f32.gmra.mxu2 %v1545_v59  ;;  %v998_v6 = vadd.f32 %v966_v1, %v901_v7  ;;  %v1160_v17 = vmul.f32 %v1417_v36, %v2220_v18  ;;  %v870_v56 = vmul.f32 %v1416_v40, %v2181_v58  ;;  %v1694_v63 = vadd.f32 %v1908_v4, %v1599_v14  ;;  %v742_v59 = vld [vmem:[#allocation2 + $0x139] sm:$0xff]  ;;  %v3133_v4 = vld [vmem:[#allocation6_spill] sm:$0xff] }
 0x13c   : > { %v528_v32 = vadd.f32 %v2553_v41, %v527_v38  ;;  %v805_v12 = vadd.f32 %v773_v57, %v708_v23  ;;  %v967_v2 = vmul.f32 %v2709_v16, %v2199_v3  ;;  %v1383_v28 = vadd.f32 %v1351_v11, %v1286_v39 }
 0x13d   : > { %v2780_v45 = vmul.f32 %v2691_v49, %v1417_v36  ;;  %v1095_v10 = vadd.f32 %v1063_v26, %v998_v6  ;;  %v1258_v33 = vmul.f32 %v2224_v19, %v2761_v15  ;;  %1726 = vst.msk [vmem:[%s2771_s21] sm:$0xff] %vm316_vm1, %v1694_v63  ;;  %v1355_v41 = vmul.f32 %v2233_v29, %v3132_v62  ;;  %v2817_v6 = vld [vmem:[#allocation2 + $0x158] sm:$0xff] }
 0x13e   : > { %v2786_v40 = vmax.f32 %v528_v32, 0.0  ;;  %v902_v0 = vadd.f32 %v870_v56, %v805_v12  ;;  %v1064_v35 = vmul.f32 %v2213_v13, %v3131_v42  ;;  %v709_v21 = vmul.f32 %v2668_v52, %v2157_v47 }
 0x13f   : > { %v1192_v25 = vadd.f32 %v1160_v17, %v1095_v10  ;;  %v774_v48 = vmul.f32 %v3130_v51, %v741_v61  ;;  %v871_v27 = vmul.f32 %v1417_v36, %v2181_v58  ;;  %v1546_v20 = vmax.f32 %v1514_v9, 0.0  ;;  %v2819_v17 = vld [vmem:[#allocation2 + $0x142] sm:$0xff] }
 0x140   : > { %v1515_v1 = vadd.f32 %v2726_v24, %v1479_v37  ;;  %648 = vst [vmem:[#allocation2 + $0x189] sm:$0xff] %v2786_v40  ;;  %v999_v54 = vadd.f32 %v967_v2, %v902_v0  ;;  %v1161_v42 = vmul.f32 %v2792_v22, %v2220_v18  ;;  %v1601_v11 = vpop.f32.mrf.mxu1  ;;  %v1480_v44 = vadd.f32 %v1448_v5, %v1383_v28  ;;  %v1909_v37 = vld [vmem:[%s2009_s8 + $0x8] sm:$0xff]  ;;  %v3134_v2 = vld [vmem:[#allocation7_spill] sm:$0xff] }
 0x141   : > { %v1290_v60 = vadd.f32 %v1258_v33, %v1192_v25  ;;  %v806_v39 = vadd.f32 %v774_v48, %v709_v21  ;;  %v968_v52 = vmul.f32 %v2761_v15, %v2199_v3  ;;  %v1602_v7 = vadd.f32 %v2738_v31, %v1601_v11  ;;  %v2835_v33 = vld [vmem:[#allocation2 + $0x15a] sm:$0xff] }
 0x142   : > { %v1096_v9 = vadd.f32 %v1064_v35, %v999_v54  ;;  %v1259_v26 = vmul.f32 %v2224_v19, %v2794_v50  ;;  %v1065_v14 = vmul.f32 %v2213_v13, %v3132_v62  ;;  %v710_v5 = vmul.f32 %v2709_v16, %v2157_v47  ;;  %v2845_v54 = vld [vmem:[#allocation2 + $0x168] sm:$0xff] }
 0x143   : > { %1648 = vmatmul.f32.gmra.mxu2 %v1546_v20  ;;  %v2811_v36 = vadd.f32 %v1355_v41, %v1290_v60  ;;  %v903_v23 = vadd.f32 %v871_v27, %v806_v39  ;;  %v775_v57 = vmul.f32 %v3130_v51, %v742_v59  ;;  %v1695_v38 = vadd.f32 %v1909_v37, %v1602_v7  ;;  %v2843_v20 = vld [vmem:[#allocation2 + $0x170] sm:$0xff]  ;;  %v743_v7 = vld [vmem:[#allocation2 + $0x141] sm:$0xff] }
 0x144   : > { %v1193_v56 = vadd.f32 %v1161_v42, %v1096_v9  ;;  %v1356_v63 = vmul.f32 %v2233_v29, %v3133_v4  ;;  %v872_v32 = vmul.f32 %v2792_v22, %v2181_v58  ;;  %v713_v12 = vmul.f32 %v2157_v47, %v2817_v6 }
 0x145   : > { %v778_v16 = vmul.f32 %v3130_v51, %v3134_v2  ;;  %v1000_v61 = vadd.f32 %v968_v52, %v903_v23  ;;  %v1162_v28 = vmul.f32 %v2819_v17, %v2220_v18  ;;  %1727 = vst.msk [vmem:[%s2771_s21 + $0x8] sm:$0xff] %vm316_vm1, %v1695_v38  ;;  %v1481_v10 = vadd.f32 %v2717_v53, %v2664_v55  ;;  %v2854_v52 = vld [vmem:[#allocation2 + $0x152] sm:$0xff] }
 0x146   : > { %v1291_v62 = vadd.f32 %v1259_v26, %v1193_v56  ;;  %v807_v41 = vadd.f32 %v775_v57, %v710_v5  ;;  %v969_v0 = vmul.f32 %v2794_v50, %v2199_v3  ;;  %v875_v25 = vmul.f32 %v2181_v58, %v2835_v33  ;;  %v1910_v38 = vld [vmem:[%s2009_s8 + $0x10] sm:$0xff] }
 0x147   : > { %v810_v35 = vadd.f32 %v778_v16, %v713_v12  ;;  %v1097_v21 = vadd.f32 %v1065_v14, %v1000_v61  ;;  %v1260_v48 = vmul.f32 %v2224_v19, %v2817_v6  ;;  %v1547_v27 = vmax.f32 %v1515_v1, 0.0 }
 0x148   : > { %v2847_v55 = vadd.f32 %v1356_v63, %v1291_v62  ;;  %v904_v53 = vadd.f32 %v872_v32, %v807_v41  ;;  %v1066_v42 = vmul.f32 %v2213_v13, %v3133_v4  ;;  %v1604_v59 = vpop.f32.mrf.mxu1  ;;  %v1516_v11 = vadd.f32 %v2726_v24, %v1480_v44  ;;  %v2866_v4 = vld [vmem:[#allocation2 + $0x172] sm:$0xff] }
 0x149   : > { %v907_v60 = vadd.f32 %v875_v25, %v810_v35  ;;  %v972_v39 = vmul.f32 %v2199_v3, %v2843_v20  ;;  %v1194_v1 = vadd.f32 %v1162_v28, %v1097_v21  ;;  %v1605_v9 = vadd.f32 %v2738_v31, %v1604_v59  ;;  %v2882_v35 = vld [vmem:[#allocation2 + $0x18a] sm:$0xff] }
 0x14a   : > { %v1357_v26 = vmul.f32 %v2233_v29, %v3134_v2  ;;  %v1001_v14 = vadd.f32 %v969_v0, %v904_v53  ;;  %v1163_v23 = vmul.f32 %v2854_v52, %v2220_v18  ;;  %v1069_v5 = vmul.f32 %v2213_v13, %v2695_v8  ;;  %v1231_v0 = vld [vmem:[#allocation2 + $0x188] sm:$0xff] }
 0x14b   : > { %1651 = vmatmul.f32.gmra.mxu2 %v1547_v27  ;;  %v1004_v44 = vadd.f32 %v972_v39, %v907_v60  ;;  %v1292_v57 = vadd.f32 %v1260_v48, %v1194_v1  ;;  %v1261_v37 = vmul.f32 %v2224_v19, %v2845_v54  ;;  %v1696_v56 = vadd.f32 %v1910_v38, %v1605_v9  ;;  %v2891_v59 = vld [vmem:[#allocation2 + $0x16a] sm:$0xff]  ;;  %v2895_v39 = vld [vmem:[#allocation2 + $0x180] sm:$0xff] }
 0x14c   : > { %v1098_v63 = vadd.f32 %v1066_v42, %v1001_v14  ;;  %v711_v32 = vmul.f32 %v2761_v15, %v2157_v47  ;;  %v776_v12 = vmul.f32 %v3130_v51, %v743_v7  ;;  %v1166_v61 = vmul.f32 %v2220_v18, %v2866_v4 }
 0x14d   : > { %v1101_v16 = vadd.f32 %v1069_v5, %v1004_v44  ;;  %v714_v28 = vmul.f32 %v2157_v47, %v2845_v54  ;;  %v779_v62 = vmul.f32 %v3130_v51, %v2654_v30  ;;  %1728 = vst.msk [vmem:[%s2771_s21 + $0x10] sm:$0xff] %vm316_vm1, %v1696_v56  ;;  %v2880_v41 = vadd.f32 %v2726_v24, %v1481_v10 }
 0x14e   : > { %v2884_v15 = vadd.f32 %v1357_v26, %v1292_v57  ;;  %v1195_v25 = vadd.f32 %v1163_v23, %v1098_v63  ;;  %v1358_v21 = vmul.f32 %v2233_v29, %v2654_v30  ;;  %v1264_v27 = vmul.f32 %v2224_v19, %v1231_v0 }
 0x14f   : > { %v1198_v48 = vadd.f32 %v1166_v61, %v1101_v16  ;;  %v1361_v53 = vmul.f32 %v2233_v29, %v2786_v40  ;;  %v811_v42 = vadd.f32 %v779_v62, %v714_v28  ;;  %v1548_v10 = vmax.f32 %v1516_v11, 0.0  ;;  %v2913_v28 = vld [vmem:[#allocation2 + $0x182] sm:$0xff] }
 0x150   : > { %v876_v60 = vmul.f32 %v2181_v58, %v2891_v59  ;;  %v1293_v1 = vadd.f32 %v1261_v37, %v1195_v25  ;;  %v808_v7 = vadd.f32 %v776_v12, %v711_v32  ;;  %v1607_v9 = vpop.f32.mrf.mxu1  ;;  %v1458_v14 = vmul.f32 %v2691_v49, %v2882_v35  ;;  %v1911_v12 = vld [vmem:[%s2009_s8 + $0x18] sm:$0xff] }
 0x151   : > { %v1296_v26 = vadd.f32 %v1264_v27, %v1198_v48  ;;  %v973_v23 = vmul.f32 %v2199_v3, %v2895_v39  ;;  %v873_v44 = vmul.f32 %v2819_v17, %v2181_v58  ;;  %v1608_v11 = vadd.f32 %v2738_v31, %v1607_v9  ;;  %v1912_v27 = vld [vmem:[#allocation2] sm:$0xff] }
 0x152   : > { %v908_v5 = vadd.f32 %v876_v60, %v811_v42  ;;  %v2904_v57 = vadd.f32 %v1358_v21, %v1293_v1  ;;  %v970_v37 = vmul.f32 %v2199_v3, %v2817_v6  ;;  %v1482_v38 = vadd.f32 %v2780_v45, %v2719_v46  ;;  %v1329_v42 = vld [vmem:[#allocation2 + $0x199] sm:$0xff] }
 0x153   : > { %1654 = vmatmul.f32.gmra.mxu2 %v1548_v10  ;;  %v1393_v56 = vadd.f32 %v1361_v53, %v1296_v26  ;;  %v1070_v63 = vmul.f32 %v2213_v13, %v2742_v43  ;;  %v905_v32 = vadd.f32 %v873_v44, %v808_v7  ;;  %v1697_v16 = vadd.f32 %v1911_v12, %v1608_v11  ;;  %v1426_v7 = vld [vmem:[#allocation2 + $0x19a] sm:$0xff]  ;;  %v744_v12 = vld [vmem:[#allocation2 + $0x151] sm:$0xff] }
 0x154   : > { %v1005_v61 = vadd.f32 %v973_v23, %v908_v5  ;;  %v1067_v62 = vmul.f32 %v2213_v13, %v3134_v2  ;;  %v1167_v6 = vmul.f32 %v2220_v18, %v2913_v28  ;;  %v715_v46 = vmul.f32 %v2843_v20, %v2157_v47 }
 0x155   : > { %v1490_v25 = vadd.f32 %v1458_v14, %v1393_v56  ;;  %v780_v45 = vmul.f32 %v3130_v51, %v2695_v8  ;;  %1729 = vst.msk [vmem:[%s2771_s21 + $0x18] sm:$0xff] %vm316_vm1, %v1697_v16  ;;  %v1549_v21 = vmax.f32 %v2880_v41, 0.0  ;;  %v1265_v53 = vmul.f32 %v1912_v27, %v2224_v19 }
 0x156   : > { %v1102_v48 = vadd.f32 %v1070_v63, %v1005_v61  ;;  %v1002_v2 = vadd.f32 %v970_v37, %v905_v32  ;;  %v1518_v10 = vadd.f32 %v2726_v24, %v1482_v38  ;;  %v1451_v60 = vmul.f32 %v2691_v49, %v2792_v22 }
 0x157   : > { %v1526_v1 = vadd.f32 %v2726_v24, %v1490_v25  ;;  %v812_v9 = vadd.f32 %v780_v45, %v715_v46  ;;  %v1362_v14 = vmul.f32 %v2233_v29, %v1329_v42  ;;  %v877_v41 = vmul.f32 %v2866_v4, %v2181_v58  ;;  %v1330_v42 = vld [vmem:[#allocation2 + $0x1a1] sm:$0xff] }
 0x158   : > { %v1199_v26 = vadd.f32 %v1167_v6, %v1102_v48  ;;  %v1099_v23 = vadd.f32 %v1067_v62, %v1002_v2  ;;  %v1610_v44 = vpop.f32.mrf.mxu1  ;;  %v974_v5 = vmul.f32 %v1231_v0, %v2199_v3  ;;  %v1164_v37 = vmul.f32 %v2220_v18, %v2835_v33  ;;  %v1913_v62 = vld [vmem:[%s2009_s8 + $0x20] sm:$0xff] }
 0x159   : > { %v1558_v11 = vmax.f32 %v1526_v1, 0.0  ;;  %v1262_v22 = vmul.f32 %v2224_v19, %v2843_v20  ;;  %v1611_v38 = vadd.f32 %v2738_v31, %v1610_v44  ;;  %v1459_v63 = vmul.f32 %v2691_v49, %v1426_v7  ;;  %v1427_v2 = vld [vmem:[#allocation2 + $0x1a2] sm:$0xff] }
 0x15a   : > { %v1297_v56 = vadd.f32 %v1265_v53, %v1199_v26  ;;  %v909_v32 = vadd.f32 %v877_v41, %v812_v9  ;;  %v1071_v16 = vmul.f32 %v2213_v13, %v2786_v40  ;;  %v1196_v0 = vadd.f32 %v1164_v37, %v1099_v23  ;;  %v1914_v37 = vld [vmem:[%s2009_s8 + $0x28] sm:$0xff] }
 0x15b   : > { %1657 = vmatmul.f32.gmra.mxu2 %v1549_v21  ;;  %1684 = vmatmul.f32.vlgmr.msrb.gmra.mxu3 %v1558_v11  ;;  %v1359_v61 = vmul.f32 %v2233_v29, %v2695_v8  ;;  %v1698_v25 = vadd.f32 %v1913_v62, %v1611_v38  ;;  %v712_v46 = vmul.f32 %v2794_v50, %v2157_v47 }
 0x15c   : > { %v1394_v20 = vadd.f32 %v1362_v14, %v1297_v56  ;;  %v1006_v6 = vadd.f32 %v974_v5, %v909_v32  ;;  %v1168_v45 = vmul.f32 %v2882_v35, %v2220_v18  ;;  %v1294_v48 = vadd.f32 %v1262_v22, %v1196_v0 }
 0x15d   : > { %v777_v21 = vmul.f32 %v3130_v51, %v744_v12  ;;  %v874_v40 = vmul.f32 %v2854_v52, %v2181_v58  ;;  %1730 = vst.msk [vmem:[%s2771_s21 + $0x20] sm:$0xff] %vm316_vm1, %v1698_v25  ;;  %v971_v47 = vmul.f32 %v2199_v3, %v2845_v54  ;;  %v1363_v51 = vmul.f32 %v2233_v29, %v1330_v42 }
 0x15e   : > { %v1491_v27 = vadd.f32 %v1459_v63, %v1394_v20  ;;  %v1103_v8 = vadd.f32 %v1071_v16, %v1006_v6  ;;  %v2955_v1 = vadd.f32 %v1359_v61, %v1294_v48  ;;  %v1550_v58 = vmax.f32 %v1518_v10, 0.0  ;;  %v1916_v6 = vld [vmem:[%s2009_s8 + $0x38] sm:$0xff] }
 0x15f   : > { %v809_v7 = vadd.f32 %v777_v21, %v712_v46  ;;  %v1483_v26 = vadd.f32 %v1451_v60, %v2759_v34  ;;  %v1068_v41 = vmul.f32 %v2213_v13, %v2654_v30  ;;  %v1460_v3 = vmul.f32 %v2691_v49, %v1427_v2 }
 0x160   : > { %v1527_v50 = vadd.f32 %v2726_v24, %v1491_v27  ;;  %v1200_v35 = vadd.f32 %v1168_v45, %v1103_v8  ;;  %v1613_v9 = vpop.f32.mrf.mxu1  ;;  %v1165_v5 = vmul.f32 %v2220_v18, %v2891_v59  ;;  %v1452_v13 = vmul.f32 %v2691_v49, %v2819_v17  ;;  %v1917_v27 = vld [vmem:[%s2009_s8 + $0x40] sm:$0xff] }
 0x161   : > { %v906_v14 = vadd.f32 %v874_v40, %v809_v7  ;;  %v1614_v23 = vadd.f32 %v2738_v31, %v1613_v9  ;;  %v1519_v60 = vadd.f32 %v2726_v24, %v1483_v26  ;;  %v1360_v18 = vmul.f32 %v2233_v29, %v2742_v43 }
 0x162   : > { %v1559_v44 = vmax.f32 %v1527_v50, 0.0  ;;  %v1298_v11 = vadd.f32 %v1265_v53, %v1200_v35  ;;  %v1263_v53 = vmul.f32 %v2224_v19, %v2895_v39  ;;  %v1484_v12 = vadd.f32 %v1452_v13, %v2811_v36  ;;  %v1915_v39 = vld [vmem:[%s2009_s8 + $0x30] sm:$0xff]  ;;  %v1918_v50 = vld [vmem:[%s2009_s8 + $0x48] sm:$0xff] }
 0x163   : > { %1660 = vmatmul.f32.gmra.mxu2 %v1550_v58  ;;  %v1003_v54 = vadd.f32 %v971_v47, %v906_v14  ;;  %v1699_v10 = vadd.f32 %v1914_v37, %v1614_v23  ;;  %v1551_v32 = vmax.f32 %v1519_v60, 0.0  ;;  %v1453_v29 = vmul.f32 %v2691_v49, %v2854_v52  ;;  %v1919_v14 = vld [vmem:[%s2009_s8 + $0x50] sm:$0xff] }
 0x164   : > { %1687 = vmatmul.f32.gmra.mxu3 %v1559_v44  ;;  %v1395_v34 = vadd.f32 %v1363_v51, %v1298_v11  ;;  %v1520_v62 = vadd.f32 %v2726_v24, %v1484_v12  ;;  %v1454_v48 = vmul.f32 %v2691_v49, %v2835_v33  ;;  %v1455_v2 = vmul.f32 %v2691_v49, %v2891_v59  ;;  %v1924_v12 = vld [vmem:[%s2009_s8 + $0x78] sm:$0xff] }
 0x165   : > { %v1100_v30 = vadd.f32 %v1068_v41, %v1003_v54  ;;  %1731 = vst.msk [vmem:[%s2771_s21 + $0x28] sm:$0xff] %vm316_vm1, %v1699_v10  ;;  %v1485_v25 = vadd.f32 %v1453_v29, %v2847_v55  ;;  %v1456_v9 = vmul.f32 %v2691_v49, %v2866_v4  ;;  %v1457_v44 = vmul.f32 %v2691_v49, %v2913_v28  ;;  %v1920_v54 = vld [vmem:[%s2009_s8 + $0x58] sm:$0xff]  ;;  %v1926_v29 = vld [vmem:[%s2009_s8 + $0x88] sm:$0xff] }
 0x166   : > { %v1492_v22 = vadd.f32 %v1460_v3, %v1395_v34  ;;  %v1552_v36 = vmax.f32 %v1520_v62, 0.0  ;;  %v1486_v40 = vadd.f32 %v1454_v48, %v2884_v15  ;;  %v1487_v47 = vadd.f32 %v1455_v2, %v2904_v57  ;;  %v1921_v34 = vld [vmem:[%s2009_s8 + $0x60] sm:$0xff]  ;;  %v1928_v48 = vld [vmem:[%s2009_s8 + $0x98] sm:$0xff]  ;;  %v1930_v2 = vld [vmem:[%s2009_s8 + $0xe8] sm:$0xff] }
 0x167   : > { %v1197_v38 = vadd.f32 %v1165_v5, %v1100_v30  ;;  %v1521_v45 = vadd.f32 %v2726_v24, %v1485_v25  ;;  %v1488_v26 = vadd.f32 %v1456_v9, %v2955_v1  ;;  %v1932_v9 = vld [vmem:[%s2009_s8 + $0xf0] sm:$0xff] }
 0x168   : > { %v1528_v56 = vadd.f32 %v2726_v24, %v1492_v22  ;;  %v1616_v63 = vpop.f32.mrf.mxu1  ;;  %v1522_v42 = vadd.f32 %v2726_v24, %v1486_v40  ;;  %v1523_v51 = vadd.f32 %v2726_v24, %v1487_v47 }
 0x169   : > { %v1295_v17 = vadd.f32 %v1263_v53, %v1197_v38  ;;  %v1617_v16 = vadd.f32 %v2738_v31, %v1616_v63  ;;  %v1553_v21 = vmax.f32 %v1521_v45, 0.0  ;;  %v1524_v23 = vadd.f32 %v2726_v24, %v1488_v26 }
 0x16a   : > { %v1560_v0 = vmax.f32 %v1528_v56, 0.0  ;;  %v1554_v7 = vmax.f32 %v1522_v42, 0.0  ;;  %v1555_v58 = vmax.f32 %v1523_v51, 0.0 }
 0x16b   : > { %1663 = vmatmul.f32.gmra.mxu2 %v1551_v32  ;;  %v1392_v19 = vadd.f32 %v1360_v18, %v1295_v17  ;;  %v1700_v61 = vadd.f32 %v1915_v39, %v1617_v16  ;;  %v1556_v11 = vmax.f32 %v1524_v23, 0.0  ;;  %v1923_v18 = vld [vmem:[%s2009_s8 + $0x70] sm:$0xff] }
 0x16c   : > { %1690 = vmatmul.f32.gmra.mxu3 %v1560_v0 }
 0x16d   : > { %1732 = vst.msk [vmem:[%s2771_s21 + $0x30] sm:$0xff] %vm316_vm1, %v1700_v61  ;;  %v1489_v3 = vadd.f32 %v1457_v44, %v1392_v19  ;;  %v1925_v19 = vld [vmem:[%s2009_s8 + $0x80] sm:$0xff]  ;;  %v1934_v44 = vld [vmem:[%s2009_s8 + $0xf8] sm:$0xff] }
 0x16f   : > { %v1525_v37 = vadd.f32 %v2726_v24, %v1489_v3  ;;  %v1922_v24 = vld [vmem:[%s2009_s8 + $0x68] sm:$0xff] }
 0x170   : > { %v1619_v43 = vpop.f32.mrf.mxu1 }
 0x171   : > { %v1620_v20 = vadd.f32 %v2738_v31, %v1619_v43  ;;  %v1557_v49 = vmax.f32 %v1525_v37, 0.0 }
 0x173   : > { %1666 = vmatmul.f32.gmra.mxu2 %v1552_v36  ;;  %v1701_v46 = vadd.f32 %v1916_v6, %v1620_v20  ;;  %v1927_v20 = vld [vmem:[%s2009_s8 + $0x90] sm:$0xff] }
 0x175   : > { %1733 = vst.msk [vmem:[%s2771_s21 + $0x38] sm:$0xff] %vm316_vm1, %v1701_v46 }
 0x178   : > { %v1622_v52 = vpop.f32.mrf.mxu1 }
 0x179   : > { %v1623_v55 = vadd.f32 %v2738_v31, %v1622_v52 }
 0x17b   : > { %1669 = vmatmul.f32.gmra.mxu2 %v1553_v21  ;;  %v1702_v8 = vadd.f32 %v1917_v27, %v1623_v55 }
 0x17d   : > { %1734 = vst.msk [vmem:[%s2771_s21 + $0x40] sm:$0xff] %vm316_vm1, %v1702_v8  ;;  %v1929_v8 = vld [vmem:[%s2009_s8 + $0xa0] sm:$0xff] }
 0x180   : > { %v1625_v33 = vpop.f32.mrf.mxu1 }
 0x181   : > { %v1626_v15 = vadd.f32 %v2738_v31, %v1625_v33 }
 0x183   : > { %1672 = vmatmul.f32.gmra.mxu2 %v1554_v7  ;;  %v1703_v35 = vadd.f32 %v1918_v50, %v1626_v15 }
 0x185   : > { %1735 = vst.msk [vmem:[%s2771_s21 + $0x48] sm:$0xff] %vm316_vm1, %v1703_v35  ;;  %v1931_v35 = vld [vmem:[%s2009_s8 + $0xa8] sm:$0xff] }
 0x188   : > { %v1628_v59 = vpop.f32.mrf.mxu1 }
 0x189   : > { %v1629_v57 = vadd.f32 %v2738_v31, %v1628_v59 }
 0x18b   : > { %1675 = vmatmul.f32.gmra.mxu2 %v1555_v58  ;;  %v1704_v41 = vadd.f32 %v1919_v14, %v1629_v57 }
 0x18d   : > { %1736 = vst.msk [vmem:[%s2771_s21 + $0x50] sm:$0xff] %vm316_vm1, %v1704_v41  ;;  %v1933_v41 = vld [vmem:[%s2009_s8 + $0xb0] sm:$0xff] }
 0x190   : > { %v1631_v4 = vpop.f32.mrf.mxu1 }
 0x191   : > { %v1632_v1 = vadd.f32 %v2738_v31, %v1631_v4 }
 0x193   : > { %1678 = vmatmul.f32.gmra.mxu2 %v1556_v11  ;;  %v1705_v5 = vadd.f32 %v1920_v54, %v1632_v1  ;;  %v1935_v1 = vld [vmem:[%s2009_s8 + $0xb8] sm:$0xff] }
 0x195   : > { %1737 = vst.msk [vmem:[%s2771_s21 + $0x58] sm:$0xff] %vm316_vm1, %v1705_v5 }
 0x198   : > { %v1634_v10 = vpop.f32.mrf.mxu1 }
 0x199   : > { %v1635_v28 = vadd.f32 %v2738_v31, %v1634_v10  ;;  %v1936_v10 = vld [vmem:[%s2009_s8 + $0xc0] sm:$0xff] }
 0x19b   : > { %1681 = vmatmul.f32.gmra.mxu2 %v1557_v49  ;;  %v1706_v60 = vadd.f32 %v1921_v34, %v1635_v28 }
 0x19d   : > { %1738 = vst.msk [vmem:[%s2771_s21 + $0x60] sm:$0xff] %vm316_vm1, %v1706_v60  ;;  %v1937_v60 = vld [vmem:[%s2009_s8 + $0xc8] sm:$0xff] }
 0x1a0   : > { %v1637_v13 = vpop.f32.mrf.mxu1 }
 0x1a1   : > { %v1638_v30 = vadd.f32 %v2738_v31, %v1637_v13 }
 0x1a3   : > { %v1707_v53 = vadd.f32 %v1922_v24, %v1638_v30 }
 0x1a5   : > { %1739 = vst.msk [vmem:[%s2771_s21 + $0x68] sm:$0xff] %vm316_vm1, %v1707_v53  ;;  %v1938_v53 = vld [vmem:[%s2009_s8 + $0xd0] sm:$0xff] }
 0x1ae   : > { %v1640_v22 = vpop.f32.mrf.mxu2 }
 0x1af   : > { %v1641_v38 = vadd.f32 %v2738_v31, %v1640_v22 }
 0x1b1   : > { %v1708_v56 = vadd.f32 %v1923_v18, %v1641_v38 }
 0x1b3   : > { %1740 = vst.msk [vmem:[%s2771_s21 + $0x70] sm:$0xff] %vm316_vm1, %v1708_v56  ;;  %v1939_v56 = vld [vmem:[%s2009_s8 + $0xd8] sm:$0xff] }
 0x1b6   : > { %v1643_v63 = vpop.f32.mrf.mxu2 }
 0x1b7   : > { %v1644_v32 = vadd.f32 %v2738_v31, %v1643_v63 }
 0x1b9   : > { %v1709_v17 = vadd.f32 %v1924_v12, %v1644_v32 }
 0x1bb   : > { %1741 = vst.msk [vmem:[%s2771_s21 + $0x78] sm:$0xff] %vm316_vm1, %v1709_v17  ;;  %v1940_v17 = vld [vmem:[%s2009_s8 + $0xe0] sm:$0xff] }
 0x1be   : > { %v1646_v16 = vpop.f32.mrf.mxu2 }
 0x1bf   : > { %v1647_v0 = vadd.f32 %v2738_v31, %v1646_v16 }
 0x1c1   : > { %v1710_v39 = vadd.f32 %v1925_v19, %v1647_v0 }
 0x1c3   : > { %1742 = vst.msk [vmem:[%s2771_s21 + $0x80] sm:$0xff] %vm316_vm1, %v1710_v39 }
 0x1c6   : > { %v1649_v61 = vpop.f32.mrf.mxu2 }
 0x1c7   : > { %v1650_v62 = vadd.f32 %v2738_v31, %v1649_v61 }
 0x1c9   : > { %v1711_v43 = vadd.f32 %v1926_v29, %v1650_v62 }
 0x1cb   : > { %1743 = vst.msk [vmem:[%s2771_s21 + $0x88] sm:$0xff] %vm316_vm1, %v1711_v43 }
 0x1ce   : > { %v1652_v36 = vpop.f32.mrf.mxu2 }
 0x1cf   : > { %v1653_v25 = vadd.f32 %v2738_v31, %v1652_v36 }
 0x1d1   : > { %v1712_v6 = vadd.f32 %v1927_v20, %v1653_v25 }
 0x1d3   : > { %1744 = vst.msk [vmem:[%s2771_s21 + $0x90] sm:$0xff] %vm316_vm1, %v1712_v6 }
 0x1d6   : > { %v1655_v46 = vpop.f32.mrf.mxu2 }
 0x1d7   : > { %v1656_v45 = vadd.f32 %v2738_v31, %v1655_v46 }
 0x1d9   : > { %v1713_v52 = vadd.f32 %v1928_v48, %v1656_v45 }
 0x1db   : > { %1745 = vst.msk [vmem:[%s2771_s21 + $0x98] sm:$0xff] %vm316_vm1, %v1713_v52 }
 0x1de   : > { %v1658_v21 = vpop.f32.mrf.mxu2  ;;  %v1685_v40 = vpop.f32.mrf.mxu3 }
 0x1df   : > { %v1659_v55 = vadd.f32 %v2738_v31, %v1658_v21  ;;  %v1686_v27 = vadd.f32 %v2738_v31, %v1685_v40 }
 0x1e1   : > { %v1714_v42 = vadd.f32 %v1929_v8, %v1659_v55  ;;  %v1723_v33 = vadd.f32 %v1930_v2, %v1686_v27 }
 0x1e3   : > { %1746 = vst.msk [vmem:[%s2771_s21 + $0xa0] sm:$0xff] %vm316_vm1, %v1714_v42 }
 0x1e4   : > { %1755 = vst.msk [vmem:[%s2771_s21 + $0xe8] sm:$0xff] %vm316_vm1, %v1723_v33 }
 0x1e6   : > { %v1661_v7 = vpop.f32.mrf.mxu2 }
 0x1e7   : > { %v1662_v47 = vadd.f32 %v2738_v31, %v1661_v7  ;;  %v1688_v15 = vpop.f32.mrf.mxu3 }
 0x1e8   : > { %v1689_v50 = vadd.f32 %v2738_v31, %v1688_v15 }
 0x1e9   : > { %v1715_v51 = vadd.f32 %v1931_v35, %v1662_v47 }
 0x1ea   : > { %v1724_v59 = vadd.f32 %v1932_v9, %v1689_v50 }
 0x1eb   : > { %1747 = vst.msk [vmem:[%s2771_s21 + $0xa8] sm:$0xff] %vm316_vm1, %v1715_v51 }
 0x1ec   : > { %1756 = vst.msk [vmem:[%s2771_s21 + $0xf0] sm:$0xff] %vm316_vm1, %v1724_v59 }
 0x1ee   : > { %v1664_v58 = vpop.f32.mrf.mxu2 }
 0x1ef   : > { %v1665_v26 = vadd.f32 %v2738_v31, %v1664_v58  ;;  %v1691_v57 = vpop.f32.mrf.mxu3 }
 0x1f0   : > { %v1692_v14 = vadd.f32 %v2738_v31, %v1691_v57 }
 0x1f1   : > { %v1716_v23 = vadd.f32 %v1933_v41, %v1665_v26 }
 0x1f2   : > { %v1725_v4 = vadd.f32 %v1934_v44, %v1692_v14 }
 0x1f3   : > { %1748 = vst.msk [vmem:[%s2771_s21 + $0xb0] sm:$0xff] %vm316_vm1, %v1716_v23 }
 0x1f4   : > { %1757 = vst.msk [vmem:[%s2771_s21 + $0xf8] sm:$0xff] %vm316_vm1, %v1725_v4 }
 0x1f6   : > { %v1667_v11 = vpop.f32.mrf.mxu2 }
 0x1f7   : > { %v1668_v3 = vadd.f32 %v2738_v31, %v1667_v11 }
 0x1f9   : > { %v1717_v54 = vadd.f32 %v1935_v1, %v1668_v3 }
 0x1fb   : > { %1749 = vst.msk [vmem:[%s2771_s21 + $0xb8] sm:$0xff] %vm316_vm1, %v1717_v54 }
 0x1fe   : > { %v1670_v5 = vpop.f32.mrf.mxu2 }
 0x1ff   : > { %v1671_v37 = vadd.f32 %v2738_v31, %v1670_v5 }
 0x201   : > { %v1718_v49 = vadd.f32 %v1936_v10, %v1671_v37 }
 0x203   : > { %1750 = vst.msk [vmem:[%s2771_s21 + $0xc0] sm:$0xff] %vm316_vm1, %v1718_v49 }
 0x206   : > { %v1673_v28 = vpop.f32.mrf.mxu2 }
 0x207   : > { %v1674_v34 = vadd.f32 %v2738_v31, %v1673_v28 }
 0x209   : > { %v1719_v13 = vadd.f32 %v1937_v60, %v1674_v34 }
 0x20b   : > { %1751 = vst.msk [vmem:[%s2771_s21 + $0xc8] sm:$0xff] %vm316_vm1, %v1719_v13 }
 0x20e   : > { %v1676_v30 = vpop.f32.mrf.mxu2 }
 0x20f   : > { %v1677_v24 = vadd.f32 %v2738_v31, %v1676_v30 }
 0x211   : > { %v1720_v22 = vadd.f32 %v1938_v53, %v1677_v24 }
 0x213   : > { %1752 = vst.msk [vmem:[%s2771_s21 + $0xd0] sm:$0xff] %vm316_vm1, %v1720_v22 }
 0x216   : > { %v1679_v38 = vpop.f32.mrf.mxu2 }
 0x217   : > { %v1680_v18 = vadd.f32 %v2738_v31, %v1679_v38 }
 0x219   : > { %v1721_v63 = vadd.f32 %v1939_v56, %v1680_v18 }
 0x21b   : > { %1753 = vst.msk [vmem:[%s2771_s21 + $0xd8] sm:$0xff] %vm316_vm1, %v1721_v63 }
 0x21e   : > { %v1682_v32 = vpop.f32.mrf.mxu2 }
 0x21f   : > { %v1683_v12 = vadd.f32 %v2738_v31, %v1682_v32 }
 0x221   : > { %v1722_v16 = vadd.f32 %v1940_v17, %v1683_v12 }
 0x223   : > { %1754 = vst.msk [vmem:[%s2771_s21 + $0xe0] sm:$0xff] %vm316_vm1, %v1722_v16 }
 0x224 PF: > { %s17_s24 = sadd.s32 1, %s1947_s24  }
 0x225   : > { %p14_p4 = scmp.ge.s32.totalorder %s17_s24, 4  }
 0x227   :  { %16 = sbr.rel (!%p14_p4) target bundleno = 1 (0x1), region = 80 }

</bundles_post_ra>
